<compile_context>
chip_gen: v5e
topology: v5e:2x2
jax: 0.10.0
libtpu: 0.0.40
codegen_flags: <defaults>
</compile_context>

<pallas_src>
import functools

import jax
import jax.numpy as jnp
from jax import lax
from jax.experimental import pallas as pl
from jax.experimental.pallas import tpu as pltpu

_NEG_INF = -1e30                      # finite mask value (no NaN on masked rows)
_VMEM_LIMIT = 48 * 1024 * 1024        # v7x-safe scoped-VMEM budget (64 MiB phys)


def _pick_tile(dim, pref):
    """Largest power-of-two tile >=128 dividing `dim`, else the full extent."""
    while pref > 128 and dim % pref:
        pref //= 2
    return pref if dim % pref == 0 else dim


# ---------------- tiled matmul (K-accumulating, bf16 MXU, f32 acc) ----------- #

def _matmul_kernel(x_ref, w_ref, o_ref, acc_ref):
    @pl.when(pl.program_id(2) == 0)
    def _():
        acc_ref[...] = jnp.zeros_like(acc_ref)

    acc_ref[...] += jnp.dot(x_ref[...], w_ref[...],
                            preferred_element_type=jnp.float32)

    @pl.when(pl.program_id(2) == pl.num_programs(2) - 1)
    def _():
        o_ref[...] = acc_ref[...].astype(o_ref.dtype)


def pallas_matmul(x, w, *, tm=256, tn=512, tk=512, out_dtype=None):
    """(M, K) @ (K, N) -> (M, N) with pipelined HBM<->VMEM tiles."""
    M, K = x.shape
    Kw, N = w.shape
    assert K == Kw
    out_dtype = out_dtype or x.dtype
    tm = _pick_tile(M, tm)
    tn = _pick_tile(N, tn)
    tk = _pick_tile(K, tk)
    return pl.pallas_call(
        _matmul_kernel,
        out_shape=jax.ShapeDtypeStruct((M, N), out_dtype),
        grid_spec=pltpu.PrefetchScalarGridSpec(
            num_scalar_prefetch=0,
            grid=(M // tm, N // tn, K // tk),
            in_specs=[
                pl.BlockSpec((tm, tk), lambda i, j, k: (i, k)),
                pl.BlockSpec((tk, tn), lambda i, j, k: (k, j)),
            ],
            out_specs=pl.BlockSpec((tm, tn), lambda i, j, k: (i, j)),
            scratch_shapes=[pltpu.VMEM((tm, tn), jnp.float32)],
        ),
        compiler_params=pltpu.CompilerParams(
            dimension_semantics=("parallel", "parallel", "arbitrary"),
            vmem_limit_bytes=_VMEM_LIMIT,
        ),
    )(x, w)


# ------------------ RoPE: single pass over the q|k columns of qkv ------------ #

def _rope_kernel(x_ref, cos_ref, sin_ref, o_ref, *, half, num_q_heads, q_scale):
    h = pl.program_id(1)
    x = x_ref[...].astype(jnp.float32)
    rotated = pltpu.roll(x, half, axis=1)          # rotate-half via XLU lane roll
    out = x * cos_ref[...] + rotated * sin_ref[...]
    # q heads get the 1/sqrt(head_dim) attention scale folded in; k heads don't.
    scl = jnp.where(h < num_q_heads, q_scale, 1.0).astype(jnp.float32)
    o_ref[...] = (out * scl).astype(o_ref.dtype)


def apply_rope_qk(qkv, cos_full, sin_signed, *, num_heads, num_kv_heads,
                  head_dim, q_scale, tq):
    """One Pallas pass rotating the q and k head columns of the fused qkv.

    Only the first (num_heads + num_kv_heads) head columns are read; v columns
    are never touched (attention reads them straight out of `qkv`).
    """
    S = qkv.shape[0]
    n_qk = num_heads + num_kv_heads
    kernel = functools.partial(_rope_kernel, half=head_dim // 2,
                               num_q_heads=num_heads, q_scale=q_scale)
    return pl.pallas_call(
        kernel,
        out_shape=jax.ShapeDtypeStruct((S, n_qk * head_dim), jnp.bfloat16),
        grid_spec=pltpu.PrefetchScalarGridSpec(
            num_scalar_prefetch=0,
            grid=(S // tq, n_qk),     # heads innermost: cos/sin DMA dedups
            in_specs=[
                pl.BlockSpec((tq, head_dim), lambda i, h: (i, h)),
                pl.BlockSpec((tq, head_dim), lambda i, h: (i, 0)),
                pl.BlockSpec((tq, head_dim), lambda i, h: (i, 0)),
            ],
            out_specs=pl.BlockSpec((tq, head_dim), lambda i, h: (i, h)),
        ),
        compiler_params=pltpu.CompilerParams(
            dimension_semantics=("parallel", "parallel"),
            vmem_limit_bytes=_VMEM_LIMIT,
        ),
    )(qkv, cos_full, sin_signed)


# -------------- flash causal attention (GQA group resident per KV tile) ------ #

def _flash_attn_kernel(q_ref, k_ref, v_ref, o_ref, m_sc, l_sc, acc_sc, *,
                       tq, tk, group, head_dim):
    i = pl.program_id(1)   # q block
    j = pl.program_id(2)   # kv block (reduction, innermost)

    @pl.when(j == 0)
    def _():
        m_sc[...] = jnp.full_like(m_sc, _NEG_INF)
        l_sc[...] = jnp.zeros_like(l_sc)
        acc_sc[...] = jnp.zeros_like(acc_sc)

    visible = j * tk <= i * tq + (tq - 1)       # intersects the lower triangle
    crosses = j * tk + (tk - 1) > i * tq        # straddles the diagonal

    @pl.when(visible)
    def _():
        k_t = k_ref[...]                        # (tk, D) bf16, shared by the group
        v_t = v_ref[...]

        def online_update(hh, s):
            m_prev = m_sc[hh]
            m_new = jnp.maximum(m_prev, jnp.max(s, axis=-1, keepdims=True))
            alpha = jnp.exp(m_prev - m_new)
            p = jnp.exp(s - m_new)
            l_sc[hh] = alpha * l_sc[hh] + jnp.sum(p, axis=-1, keepdims=True)
            acc_sc[hh] = alpha * acc_sc[hh] + jnp.dot(
                p.astype(v_t.dtype), v_t, preferred_element_type=jnp.float32)
            m_sc[hh] = m_new

        for hh in range(group):                 # GQA: every q head of this kv head
            q_h = q_ref[:, hh * head_dim:(hh + 1) * head_dim]
            # NT contraction on the MXU — no K transpose in the hot loop.
            s = lax.dot_general(q_h, k_t,
                                dimension_numbers=(((1,), (1,)), ((), ())),
                                preferred_element_type=jnp.float32)   # (tq, tk)

            @pl.when(jnp.logical_not(crosses))   # fully inside triangle: no mask
            def _():
                online_update(hh, s)

            @pl.when(crosses)                    # diagonal block: apply causal mask
            def _():
                row = i * tq + lax.broadcasted_iota(jnp.int32, (tq, tk), 0)
                col = j * tk + lax.broadcasted_iota(jnp.int32, (tq, tk), 1)
                online_update(hh, jnp.where(col <= row, s, _NEG_INF))

    @pl.when(j == pl.num_programs(2) - 1)
    def _():
        for hh in range(group):
            inv_l = pl.reciprocal(l_sc[hh], approx=True)   # EUP, not VPU divide
            o_ref[:, hh * head_dim:(hh + 1) * head_dim] = (
                acc_sc[hh] * inv_l).astype(o_ref.dtype)


def flash_attention_gqa(qk_rot, qkv, *, num_heads, num_kv_heads, head_dim, tq, tk):
    S = qkv.shape[0]
    group = num_heads // num_kv_heads
    q_size = num_heads * head_dim

    def kv_block(i, j):
        # Clamp the KV block index: causally-invisible steps repeat the previous
        # index, so Pallas dedups their DMA (no wasted KV HBM traffic).
        return jnp.minimum(j, (i * tq + tq - 1) // tk)

    kernel = functools.partial(_flash_attn_kernel, tq=tq, tk=tk,
                               group=group, head_dim=head_dim)
    return pl.pallas_call(
        kernel,
        out_shape=jax.ShapeDtypeStruct((S, q_size), jnp.bfloat16),
        grid_spec=pltpu.PrefetchScalarGridSpec(
            num_scalar_prefetch=0,
            grid=(num_kv_heads, S // tq, S // tk),
            in_specs=[
                # q: the whole query-head group of this kv head (contiguous lanes).
                pl.BlockSpec((tq, group * head_dim), lambda g, i, j: (i, g)),
                # k / v: one tile per kv head, DMA'd once per (g, i, j) step and
                # reused for every query head in the group.
                pl.BlockSpec((tk, head_dim),
                             lambda g, i, j: (kv_block(i, j), num_heads + g)),
                pl.BlockSpec((tk, head_dim),
                             lambda g, i, j: (kv_block(i, j),
                                              num_heads + num_kv_heads + g)),
            ],
            out_specs=pl.BlockSpec((tq, group * head_dim), lambda g, i, j: (i, g)),
            scratch_shapes=[
                pltpu.VMEM((group, tq, 1), jnp.float32),          # m (running max)
                pltpu.VMEM((group, tq, 1), jnp.float32),          # l (running denom)
                pltpu.VMEM((group, tq, head_dim), jnp.float32),   # acc
            ],
        ),
        compiler_params=pltpu.CompilerParams(
            dimension_semantics=("parallel", "parallel", "arbitrary"),
            vmem_limit_bytes=_VMEM_LIMIT,
        ),
    )(qk_rot, qk_rot, qkv)


# ------------------------------ Module wrapper ------------------------------- #

def phimoe_attention_forward(
    positions,       # (S,) int32
    hidden_states,   # (S, hidden)
    w_qkv,           # (hidden, q_size + 2*kv_size)
    w_o,             # (num_heads*head_dim, hidden)
    *,
    num_heads,
    num_kv_heads,
    head_dim,
    rope_theta,
):
    S, _ = hidden_states.shape
    half = head_dim // 2
    scale = head_dim ** (-0.5)

    # bf16 on the MXU (f32 accumulation inside the kernels).
    h_bf = hidden_states.astype(jnp.bfloat16)
    w_qkv_bf = w_qkv.astype(jnp.bfloat16)   # TODO(synk): pre-convert weights offline
    w_o_bf = w_o.astype(jnp.bfloat16)

    # 1) fused QKV projection (tiled Pallas matmul, bf16 out).
    qkv = pallas_matmul(h_bf, w_qkv_bf)                           # (S, q+2kv) bf16

    # rotary tables (full head_dim lane width); sin carries the rotate-half sign.
    inv_freq = 1.0 / (
        rope_theta ** (jnp.arange(0, half, dtype=jnp.float32) * 2.0 / head_dim))
    freqs = positions.astype(jnp.float32)[:, None] * inv_freq[None, :]
    cos_h, sin_h = jnp.cos(freqs), jnp.sin(freqs)
    cos_full = jnp.concatenate([cos_h, cos_h], axis=-1)           # (S, D)
    sin_signed = jnp.concatenate([-sin_h, sin_h], axis=-1)        # (S, D)

    tq = _pick_tile(S, 256)
    tk = _pick_tile(S, 256)

    # 2) one RoPE pass over q|k columns of qkv (q pre-scaled by 1/sqrt(d));
    #    v is never copied.
    qk_rot = apply_rope_qk(qkv, cos_full, sin_signed, num_heads=num_heads,
                           num_kv_heads=num_kv_heads, head_dim=head_dim,
                           q_scale=scale, tq=tq)

    # 3) flash causal attention with in-kernel GQA grouping + causal KV-DMA skip.
    attn = flash_attention_gqa(qk_rot, qkv, num_heads=num_heads,
                               num_kv_heads=num_kv_heads, head_dim=head_dim,
                               tq=tq, tk=tk)

    # 4) output projection — attn already (S, num_heads*head_dim): feed directly.
    return pallas_matmul(attn, w_o_bf, out_dtype=hidden_states.dtype)


# ------------------------------ Pure-JAX reference --------------------------- #

def reference_forward(positions, hidden_states, w_qkv, w_o, *, num_heads,
                      num_kv_heads, head_dim, rope_theta):
    """Reference mirroring the kernel's bf16 rounding points (f32 accumulation)."""
    bf = jnp.bfloat16
    S, _ = hidden_states.shape
    q_size = num_heads * head_dim
    kv_size = num_kv_heads * head_dim
    half = head_dim // 2
    scale = head_dim ** (-0.5)
    group = num_heads // num_kv_heads

    qkv = jnp.dot(hidden_states.astype(bf), w_qkv.astype(bf),
                  preferred_element_type=jnp.float32).astype(bf)
    q = qkv[:, :q_size].astype(jnp.float32).reshape(S, num_heads, head_dim)
    k = qkv[:, q_size:q_size + kv_size].astype(jnp.float32).reshape(
        S, num_kv_heads, head_dim)
    v = qkv[:, q_size + kv_size:].reshape(S, num_kv_heads, head_dim)   # bf16

    inv_freq = 1.0 / (
        rope_theta ** (jnp.arange(0, half, dtype=jnp.float32) * 2.0 / head_dim))
    freqs = positions.astype(jnp.float32)[:, None] * inv_freq[None, :]
    cos = jnp.cos(freqs)[:, None, :]
    sin = jnp.sin(freqs)[:, None, :]

    def rope(x):
        x1, x2 = x[..., :half], x[..., half:]
        return jnp.concatenate([x1 * cos - x2 * sin, x2 * cos + x1 * sin], axis=-1)

    q = (rope(q) * scale).astype(bf)
    k = rope(k).astype(bf)
    k = jnp.repeat(k, group, axis=1)
    v = jnp.repeat(v, group, axis=1)

    s = jnp.einsum("qhd,khd->hqk", q, k, preferred_element_type=jnp.float32)
    mask = jnp.tril(jnp.ones((S, S), dtype=bool))
    s = jnp.where(mask[None], s, -jnp.inf)
    p = jax.nn.softmax(s, axis=-1)
    o = jnp.einsum("hqk,khd->qhd", p.astype(bf), v,
                   preferred_element_type=jnp.float32)
    o = o.reshape(S, num_heads * head_dim).astype(bf)
    return jnp.dot(o, w_o.astype(bf), preferred_element_type=jnp.float32)


# ----------------------------------- Main ------------------------------------ #

if __name__ == "__main__":
    # Small config consistent with the module; head_dim=128 matches real PhiMoE
    # and keeps every BlockSpec lane dimension 128-aligned.
    hidden_size = 512
    num_heads = 4
    num_kv_heads = 2
    head_dim = hidden_size // num_heads  # 128
    rope_theta = 10000.0
    seq = 128

    q_size = num_heads * head_dim
    kv_size = num_kv_heads * head_dim

    key = jax.random.PRNGKey(0)
    k1, k2, k3 = jax.random.split(key, 3)

    hidden_states = jax.random.normal(k1, (seq, hidden_size), dtype=jnp.float32)
    # attention_bias=False -> weight-only projections.
    w_qkv = jax.random.normal(k2, (hidden_size, q_size + 2 * kv_size),
                              dtype=jnp.float32) * 0.05
    w_o = jax.random.normal(k3, (q_size, hidden_size), dtype=jnp.float32) * 0.05
    positions = jnp.arange(seq, dtype=jnp.int32)

    out = phimoe_attention_forward(
        positions, hidden_states, w_qkv, w_o,
        num_heads=num_heads, num_kv_heads=num_kv_heads,
        head_dim=head_dim, rope_theta=rope_theta,
    )
    out = jax.block_until_ready(out)

    ref = reference_forward(
        positions, hidden_states, w_qkv, w_o,
        num_heads=num_heads, num_kv_heads=num_kv_heads,
        head_dim=head_dim, rope_theta=rope_theta,
    )

    assert out.shape == (seq, hidden_size)
    max_err = float(jnp.max(jnp.abs(out - ref)))
    assert jnp.allclose(out, ref, atol=2e-2, rtol=2e-2), f"max err {max_err}"

    print("KERNEL_OK")
</pallas_src>

<mosaic_0001>
module attributes {stable_mosaic.version = 11 : i64} {
  func.func @_matmul_kernel(%arg0: i32, %arg1: i32, %arg2: i32, %arg3: memref<128x512xbf16, #tpu.memory_space<vmem>>, %arg4: memref<512x512xbf16, #tpu.memory_space<vmem>>, %arg5: memref<128x512xbf16, #tpu.memory_space<vmem>>, %arg6: memref<128x512xf32, #tpu.memory_space<vmem>>) attributes {dimension_semantics = [#tpu.dimension_semantics<parallel>, #tpu.dimension_semantics<parallel>, #tpu.dimension_semantics<arbitrary>], iteration_bounds = array<i64: 1, 2, 1>, scalar_prefetch = 0 : i64, scratch_operands = 1 : i64, tpu.core_type = #tpu.core_type<tc>, window_params = [{transform_indices = @transform_0, window_bounds = array<i64: 128, 512>}, {transform_indices = @transform_1, window_bounds = array<i64: 512, 512>}, {transform_indices = @transform_2, window_bounds = array<i64: 128, 512>}]} {
    %c0_i32 = arith.constant 0 : i32
    %0 = arith.cmpi eq, %arg2, %c0_i32 : i32
    %1 = arith.extui %0 : i1 to i32
    %c0_i32_0 = arith.constant 0 : i32
    %2 = arith.cmpi ne, %1, %c0_i32_0 : i32
    scf.if %2 {
      %cst_10 = arith.constant 0.000000e+00 : f32
      %12 = vector.broadcast %cst_10 : f32 to vector<128x512xf32>
      %c0_11 = arith.constant 0 : index
      %c0_12 = arith.constant 0 : index
      %13 = vector.load %arg6[%c0_11, %c0_12] : memref<128x512xf32, #tpu.memory_space<vmem>>, vector<128x512xf32>
      tpu.vector_store %arg6[%c0_11, %c0_12], %12 {strides = array<i32>} : memref<128x512xf32, #tpu.memory_space<vmem>>, vector<128x512xf32>,
    } else {
    }
    %c0 = arith.constant 0 : index
    %c0_1 = arith.constant 0 : index
    %3 = vector.load %arg6[%c0, %c0_1] : memref<128x512xf32, #tpu.memory_space<vmem>>, vector<128x512xf32>
    %c0_2 = arith.constant 0 : index
    %c0_3 = arith.constant 0 : index
    %4 = vector.load %arg3[%c0_2, %c0_3] : memref<128x512xbf16, #tpu.memory_space<vmem>>, vector<128x512xbf16>
    %c0_4 = arith.constant 0 : index
    %c0_5 = arith.constant 0 : index
    %5 = vector.load %arg4[%c0_4, %c0_5] : memref<512x512xbf16, #tpu.memory_space<vmem>>, vector<512x512xbf16>
    %cst = arith.constant dense<0.000000e+00> : vector<128x512xf32>
    %6 = tpu.matmul %4, %5, %cst {dimension_numbers = #tpu.dot_dimension_numbers<[1], [0], [0], [1], [0, 0, 1, 1], [], []>} : vector<128x512xbf16>, vector<512x512xbf16>, vector<128x512xf32> -> vector<128x512xf32>
    %7 = arith.addf %3, %6 : vector<128x512xf32>
    %c0_6 = arith.constant 0 : index
    %c0_7 = arith.constant 0 : index
    %8 = vector.load %arg6[%c0_6, %c0_7] : memref<128x512xf32, #tpu.memory_space<vmem>>, vector<128x512xf32>
    tpu.vector_store %arg6[%c0_6, %c0_7], %7 {strides = array<i32>} : memref<128x512xf32, #tpu.memory_space<vmem>>, vector<128x512xf32>,
    %c0_i32_8 = arith.constant 0 : i32
    %9 = arith.cmpi eq, %arg2, %c0_i32_8 : i32
    %10 = arith.extui %9 : i1 to i32
    %c0_i32_9 = arith.constant 0 : i32
    %11 = arith.cmpi ne, %10, %c0_i32_9 : i32
    scf.if %11 {
      %c0_10 = arith.constant 0 : index
      %c0_11 = arith.constant 0 : index
      %12 = vector.load %arg6[%c0_10, %c0_11] : memref<128x512xf32, #tpu.memory_space<vmem>>, vector<128x512xf32>
      %13 = arith.truncf %12 : vector<128x512xf32> to vector<128x512xbf16>
      %c0_12 = arith.constant 0 : index
      %c0_13 = arith.constant 0 : index
      %14 = vector.load %arg5[%c0_12, %c0_13] : memref<128x512xbf16, #tpu.memory_space<vmem>>, vector<128x512xbf16>
      tpu.vector_store %arg5[%c0_12, %c0_13], %13 {strides = array<i32>} : memref<128x512xbf16, #tpu.memory_space<vmem>>, vector<128x512xbf16>,
    } else {
    }
    return
  }
  func.func @transform_0(%arg0: i32, %arg1: i32, %arg2: i32) -> (i32, i32) {
    %c0_i32 = arith.constant 0 : i32
    return %arg0, %arg2 : i32, i32
  }
  func.func @transform_1(%arg0: i32, %arg1: i32, %arg2: i32) -> (i32, i32) {
    %c0_i32 = arith.constant 0 : i32
    return %arg2, %arg1 : i32, i32
  }
  func.func @transform_2(%arg0: i32, %arg1: i32, %arg2: i32) -> (i32, i32) {
    %c0_i32 = arith.constant 0 : i32
    return %arg0, %arg1 : i32, i32
  }
}

</mosaic_0001>

<bundles_post_ra>
// kernel: tpu_custom_call.1
= control target key start
LH: loop header
LB: loop body
LE: loop exit
PB: predicated region body
PF: predicated region fallthrough
CT: control target
= control target key end

     0   :  { %7 = vsyncpa [#allocation4], 0  ;;  %s4291_s0 = inlined_call_operand.hbm [shape: bf16[128,512], index: 0, kind: input, shape index: {}]   ;;  %s4292_s1 = inlined_call_operand.hbm [shape: bf16[512,1024], index: 1, kind: input, shape index: {}]   ;;  %s4293_s2 = inlined_call_operand.hbm [shape: bf16[128,1024], index: 2, kind: output, shape index: {}]  }
   0x1   :  { %8 = vsyncpa [#allocation7], 0 }
   0x2   :  { %10 = vsyncpa [#allocation7 + $0x1], 0 }
   0x3   :  { %11 = vsyncpa [#allocation5], 0 }
   0x4   :  { %13 = vsyncpa [#allocation5 + $0x1], 0  ;;  %s3555_s9 = smov 0   ;;  %s3557_s10 = smov 0  }
   0x5   :  { %s3559_s11 = smov 0   ;;  %s3561_s12 = smov 0  }
   0x6   :  { %s3563_s13 = smov 0   ;;  %s3565_s14 = smov 0  }
   0x7 LB: > { %s2487_s15 = sadd.s32 4294967295, %s3531_s14   ;;  %s2488_s16 = sadd.s32 4294967294, %s3531_s14   ;;  %s3531_s14 = sphi %s3565_s14, %s19_s14   ;;  %s3527_s13 = sphi %s3563_s13, %s4311_s13   ;;  %s3523_s12 = sphi %s3561_s12, %s4310_s12   ;;  %s3519_s11 = sphi %s3559_s11, %s4309_s11   ;;  %s3515_s10 = sphi %s3557_s10, %s4308_s10   ;;  %s3511_s9 = sphi %s3555_s9, %s4307_s9  }
   0x8   : > { %p88_p0 = scmp.ne.s32.totalorder %s3515_s10, %s3511_s9  ;;  %p3589_p1 = scmp.eq.s32.totalorder %s2487_s15, 0 }
   0x9   : > { %p3593_p2 = scmp.eq.s32.totalorder %s2487_s15, 1  ;;  %p120_p3 = scmp.eq.s32.totalorder %s2488_s16, 1 }
   0xa   : > { %p3599_p4 = por %p3589_p1, %p88_p0  ;;  %p2489_p5 = scmp.ge.s32.totalorder %s3531_s14, 1 }
   0xb   : > { %p3604_p6 = por %p120_p3, %p88_p0  ;;  %p127_p7 = scmp.lt.s32.totalorder %s3531_s14, 3 }
   0xc   : > { %s144_s23 = sshll.u32 %s4291_s0, 4  ;;  %s3533_s25 = smov [#allocation3]   ;;  %s145_s23 = int_to_ptr.hbm [resolvable:$true] %s144_s23 }
   0xd   : > { %p3612_p8 = pnand %p2489_p5, %p127_p7  ;;  %s146_s26 = sshll.u32 %s3533_s25, 4  ;;  %s147_s26 = int_to_ptr.vmem [resolvable:$true] %s146_s26 }
   0xe   : > { %p2491_p11 = scmp.ge.s32.totalorder %s3531_s14, 2  ;;  %s4294_s27 = smov 256  }
   0xf   : > { %p3314_p9 = pneg %p3612_p8  ;;  %s3535_s28 = smov 16  }
  0x10   : > { %s34_s29 = sadd.s32 1, %s3527_s13  ;;  %s75_s30 = sadd.s32 1, %s3519_s11 }
  0x11   : > { %p3315_p10 = pnand %p3314_p9, %p3589_p1  ;;  %p36_p12 = scmp.ge.s32.totalorder %s34_s29, 2 }
  0x12   : > { %p82_p13 = scmp.ne.s32.totalorder %s3519_s11, %s3515_s10  ;;  %p83_p0 = scmp.eq.s32.totalorder %s3531_s14, 0 }
  0x13   : > { %3317 = dma.hbm_to_vmem [thread:$0]  (!%p3315_p10), %s145_s23, 4096, %s147_s26, [#allocation4], %s4294_s27, %s4294_s27, %s3535_s28  }
  0x14   : > { %s4313_s29 = smov (%p36_p12, %s34_s29), 0  ;;  %p3631_p3 = por %p83_p0, %p82_p13 }
  0x15   : > { %p3637_p5 = por %p3593_p2, %p82_p13  ;;  %s71_s5 = ssub.s32 %s3527_s13, %s4313_s29 }
  0x16   : > { %p3327_p7 = scmp.lt.s32.totalorder %s3531_s14, 2  ;;  %p73_p9 = scmp.eq.s32.totalorder %s71_s5, 0 }
  0x17   : > { %s160_s6 = sand.u32 1, %s3519_s11   ;;  %s3144_s15 = sshll.u32 %s3527_s13, 4 }
  0x18   : > { %s2492_s7 = sshll.u32 %s160_s6, 10  ;;  %s172_s22 = scalar_lea.hbm %s4292_s1, %s3144_s15 }
  0x19   : > { %s3646_s8 = scalar_select %p73_p9, %s3519_s11, %s75_s30  }
  0x1a   : > { %s164_s23 = scalar_lea.vmem [#allocation6], %s2492_s7  ;;  %s173_s18 = sshll.u32 %s172_s22, 4  ;;  %s174_s18 = int_to_ptr.hbm [resolvable:$true] %s173_s18 }
  0x1b   : > { %s175_s25 = sshll.u32 %s164_s23, 4  ;;  %p3319_p2 = pnand %p3327_p7, %p3631_p3  ;;  %s176_s25 = int_to_ptr.vmem [resolvable:$true] %s175_s25 }
  0x1c   : > { %s161_s26 = scalar_lea.sflag [#allocation7], %s160_s6  ;;  %s3536_s27 = smov 512  }
  0x1d   : > { %s4304_s5 = smov 256   ;;  %187 = sbr.rel (%p3612_p8) target bundleno = 722 (0x2d2), region = 28 }
  0x1e   : > { %3321 = dma.hbm_to_vmem [thread:$0]  (!%p3319_p2), %s174_s18, 16384, %s176_s25, %s161_s26, %s3536_s27, %s4304_s5, %s3535_s28  }
  0x22   : > { %3498 = dma.done.wait (%p3589_p1), [#allocation4], 4096  }
  0x23   : > { %3500 = vsyncadd (%p3589_p1), [#allocation4], 4294963200  ;;  %s3663_s30 = sand.u32 1, %s3515_s10  }
  0x24   : > { %s2497_s3 = sshll.u32 %s3663_s30, 10  ;;  %s195_s6 = scalar_lea.sflag [#allocation7], %s3663_s30 }
  0x25   : > { %s3667_s7 = scalar_lea.vmem [#allocation6], %s2497_s3 }
  0x26   : > { %3502 = dma.done.wait (%p3599_p4), %s195_s6, 16384  }
  0x27   : > { %3504 = vsyncadd (%p3599_p4), %s195_s6, 4294950912  ;;  %v2741_v0 = vld [vmem:[%s3667_s7 + $0xe0] sm:$0xf]  ;;  %v3207_v1 = vld [vmem:[%s3667_s7 + $0xec] sm:$0xf0]  ;;  %s2498_s17 = sshll.u32 %s3663_s30, 8 }
  0x28   : > { %v2869_v2 = vld [vmem:[%s3667_s7 + $0x1e0] sm:$0xf]  ;;  %v2742_v3 = vor.u32 %v3207_v1, %v2741_v0  ;;  %v3239_v4 = vld [vmem:[%s3667_s7 + $0x1ec] sm:$0xf0]  ;;  %s4051_s19 = scalar_lea.vmem [#allocation8], %s2498_s17  ;;  %s3305_s24 = sshll.u32 %s3523_s12, 4 }
  0x29   : > { %v2997_v5 = vld [vmem:[%s3667_s7 + $0x2e0] sm:$0xf]  ;;  %v3271_v6 = vld [vmem:[%s3667_s7 + $0x2ec] sm:$0xf0]  ;;  %v2870_v7 = vor.u32 %v3239_v4, %v2869_v2  ;;  %s2376_s15 = scalar_lea.hbm %s4293_s2, %s3305_s24  ;;  %s2377_s16 = sshll.u32 %s4051_s19, 4  ;;  %s2378_s16 = int_to_ptr.vmem [resolvable:$true] %s2377_s16 }
  0x2a   : > { %v2998_v8 = vor.u32 %v3271_v6, %v2997_v5  ;;  %v3125_v9 = vld [vmem:[%s3667_s7 + $0x3e0] sm:$0xf]  ;;  %v3303_v10 = vld [vmem:[%s3667_s7 + $0x3ec] sm:$0xf0]  ;;  %1318 = vmatpush.bf16.msra.mxu0 %v2742_v3  ;;  %s2379_s21 = sshll.u32 %s2376_s15, 4  ;;  %s2362_s12 = scalar_lea.sflag [#allocation5], %s3663_s30  ;;  %s2380_s21 = int_to_ptr.hbm [resolvable:$true] %s2379_s21 }
  0x2b   : > { %v2725_v11 = vld [vmem:[%s3667_s7 + $0xc0] sm:$0xf]  ;;  %v3126_v12 = vor.u32 %v3303_v10, %v3125_v9  ;;  %v3203_v13 = vld [vmem:[%s3667_s7 + $0xcc] sm:$0xf0]  ;;  %1367 = vmatpush.bf16.msra.mxu1 %v2870_v7  ;;  %s3459_s22 = sshra.s32 %s2380_s21, 4  ;;  %s3465_s26 = scalar_lea.hbm %s4293_s2, 512  ;;  %s3460_s22 = int_to_ptr.hbm [resolvable:$true] %s3459_s22 }
  0x2c   : > { %v2853_v14 = vld [vmem:[%s3667_s7 + $0x1c0] sm:$0xf]  ;;  %v3235_v15 = vld [vmem:[%s3667_s7 + $0x1cc] sm:$0xf0]  ;;  %1416 = vmatpush.bf16.msra.mxu2 %v2998_v8  ;;  %v2726_v16 = vor.u32 %v3203_v13, %v2725_v11  ;;  %s3461_s23 = scalar_lea.hbm %s3460_s22, 256  ;;  %p3466_p10 = scmp.lt.s32.totalorder %s3460_s22, %s4293_s2 }
  0x2d   : > { %v2854_v17 = vor.u32 %v3235_v15, %v2853_v14  ;;  %v2981_v18 = vld [vmem:[%s3667_s7 + $0x2c0] sm:$0xf]  ;;  %v3267_v19 = vld [vmem:[%s3667_s7 + $0x2cc] sm:$0xf0]  ;;  %1465 = vmatpush.bf16.msra.mxu3 %v3126_v12  ;;  %p3462_p1 = scmp.ne.s32.totalorder %s3460_s22, %s3461_s23  ;;  %p3467_p12 = scmp.lt.s32.totalorder %s3465_s26, %s3461_s23 }
  0x2e   : > { %v3109_v20 = vld [vmem:[%s3667_s7 + $0x3c0] sm:$0xf]  ;;  %v2982_v21 = vor.u32 %v3267_v19, %v2981_v18  ;;  %v3299_v22 = vld [vmem:[%s3667_s7 + $0x3cc] sm:$0xf0]  ;;  %1319 = vmatpush.bf16.msra.mxu0 %v2726_v16 }
  0x2f   : > { %v2709_v23 = vld [vmem:[%s3667_s7 + $0xa0] sm:$0xf]  ;;  %v3199_v24 = vld [vmem:[%s3667_s7 + $0xac] sm:$0xf0]  ;;  %v3110_v25 = vor.u32 %v3299_v22, %v3109_v20  ;;  %1368 = vmatpush.bf16.msra.mxu1 %v2854_v17  ;;  %p3463_p4 = pnand %p3462_p1, %p3637_p5  ;;  %p3468_p13 = por %p3467_p12, %p3466_p10 }
  0x30   : > { %v2837_v26 = vld [vmem:[%s3667_s7 + $0x1a0] sm:$0xf]  ;;  %v3231_v27 = vld [vmem:[%s3667_s7 + $0x1ac] sm:$0xf0]  ;;  %v2710_v29 = vor.u32 %v3199_v24, %v2709_v23  ;;  %1417 = vmatpush.bf16.msra.mxu2 %v2982_v21 }
  0x31   : > { %v2965_v28 = vld [vmem:[%s3667_s7 + $0x2a0] sm:$0xf]  ;;  %v3263_v30 = vld [vmem:[%s3667_s7 + $0x2ac] sm:$0xf0]  ;;  %v2838_v33 = vor.u32 %v3231_v27, %v2837_v26  ;;  %1466 = vmatpush.bf16.msra.mxu3 %v3110_v25  ;;  %p3464_p8 = pneg %p3463_p4 }
  0x32   : > { %v3093_v31 = vld [vmem:[%s3667_s7 + $0x3a0] sm:$0xf]  ;;  %v3295_v32 = vld [vmem:[%s3667_s7 + $0x3ac] sm:$0xf0]  ;;  %v2966_v34 = vor.u32 %v3263_v30, %v2965_v28  ;;  %1320 = vmatpush.bf16.msra.mxu0 %v2710_v29  ;;  %v3145_v30 = vld [vmem:[#allocation3 + $0x4] sm:$0xf] }
  0x33   : > { %v2693_v35 = vld [vmem:[%s3667_s7 + $0x80] sm:$0xf]  ;;  %v3195_v36 = vld [vmem:[%s3667_s7 + $0x8c] sm:$0xf0]  ;;  %v3094_v38 = vor.u32 %v3295_v32, %v3093_v31  ;;  %1369 = vmatpush.bf16.msra.mxu1 %v2838_v33  ;;  %v2503_v31 = vld [vmem:[#allocation3 + $0x10] sm:$0xf0]  ;;  %p3469_p0 = pnand %p3468_p13, %p3464_p8 }
  0x34   : > { %v2821_v37 = vld [vmem:[%s3667_s7 + $0x180] sm:$0xf]  ;;  %v3227_v39 = vld [vmem:[%s3667_s7 + $0x18c] sm:$0xf0]  ;;  %v2694_v44 = vor.u32 %v3195_v36, %v2693_v35  ;;  %1418 = vmatpush.bf16.msra.mxu2 %v2966_v34  ;;  %v3269_v32 = vld [vmem:[%s3667_s7 + $0x2e4] sm:$0xf] }
  0x35   : > { %v2949_v40 = vld [vmem:[%s3667_s7 + $0x280] sm:$0xf]  ;;  %v3259_v41 = vld [vmem:[%s3667_s7 + $0x28c] sm:$0xf0]  ;;  %v2822_v45 = vor.u32 %v3227_v39, %v2821_v37  ;;  %1467 = vmatpush.bf16.msra.mxu3 %v3094_v38  ;;  %v2999_v33 = vld [vmem:[%s3667_s7 + $0x2f0] sm:$0xf0] }
  0x36   : > { %v3077_v42 = vld [vmem:[%s3667_s7 + $0x380] sm:$0xf]  ;;  %v3291_v43 = vld [vmem:[%s3667_s7 + $0x38c] sm:$0xf0]  ;;  %v2950_v46 = vor.u32 %v3259_v41, %v2949_v40  ;;  %1321 = vmatpush.bf16.msra.mxu0 %v2694_v44  ;;  %v2509_v35 = vld [vmem:[#allocation3 + $0x8] sm:$0xf]  ;;  %v3002_v44 = vor.u32 %v3269_v32, %v2999_v33 }
  0x37   : > { %v2677_v47 = vld [vmem:[%s3667_s7 + $0x60] sm:$0xf]  ;;  %v3191_v48 = vld [vmem:[%s3667_s7 + $0x6c] sm:$0xf0]  ;;  %v3078_v50 = vor.u32 %v3291_v43, %v3077_v42  ;;  %1370 = vmatpush.bf16.msra.mxu1 %v2822_v45  ;;  %v3301_v36 = vld [vmem:[%s3667_s7 + $0x3e4] sm:$0xf] }
  0x38   : > { %v2805_v49 = vld [vmem:[%s3667_s7 + $0x160] sm:$0xf]  ;;  %v3223_v51 = vld [vmem:[%s3667_s7 + $0x16c] sm:$0xf0]  ;;  %v2678_v56 = vor.u32 %v3191_v48, %v2677_v47  ;;  %1419 = vmatpush.bf16.msra.mxu2 %v2950_v46  ;;  %v3127_v37 = vld [vmem:[%s3667_s7 + $0x3f0] sm:$0xf0] }
  0x39   : > { %v2933_v52 = vld [vmem:[%s3667_s7 + $0x260] sm:$0xf]  ;;  %v3255_v53 = vld [vmem:[%s3667_s7 + $0x26c] sm:$0xf0]  ;;  %v2806_v57 = vor.u32 %v3223_v51, %v2805_v49  ;;  %1468 = vmatpush.bf16.msra.mxu3 %v3078_v50  ;;  %v3148_v40 = vld [vmem:[#allocation3 + $0x14] sm:$0xf0]  ;;  %v3130_v49 = vor.u32 %v3301_v36, %v3127_v37 }
  0x3a   : > { %v3061_v54 = vld [vmem:[%s3667_s7 + $0x360] sm:$0xf]  ;;  %v3287_v55 = vld [vmem:[%s3667_s7 + $0x36c] sm:$0xf0]  ;;  %v2934_v58 = vor.u32 %v3255_v53, %v2933_v52  ;;  %1322 = vmatpush.bf16.msra.mxu0 %v2678_v56  ;;  %v3146_v41 = vld [vmem:[#allocation3 + $0xc] sm:$0xf]  ;;  %v3749_v53 = vor.u32 %v3145_v30, %v2503_v31 }
  0x3b   : > { %v2661_v59 = vld [vmem:[%s3667_s7 + $0x40] sm:$0xf]  ;;  %v3187_v60 = vld [vmem:[%s3667_s7 + $0x4c] sm:$0xf0]  ;;  %v3062_v62 = vor.u32 %v3287_v55, %v3061_v54  ;;  %1371 = vmatpush.bf16.msra.mxu1 %v2806_v57  ;;  %v2511_v42 = vld [vmem:[#allocation3 + $0x18] sm:$0xf0]  ;;  %v3751_v54 = vor.u32 %v3148_v40, %v2509_v35 }
  0x3c   : > { %v2789_v61 = vld [vmem:[%s3667_s7 + $0x140] sm:$0xf]  ;;  %v3219_v63 = vld [vmem:[%s3667_s7 + $0x14c] sm:$0xf0]  ;;  %v2662_v4 = vor.u32 %v3187_v60, %v2661_v59  ;;  %1420 = vmatpush.bf16.msra.mxu2 %v2934_v58  ;;  %v3205_v45 = vld [vmem:[%s3667_s7 + $0xe4] sm:$0xf]  ;;  %v3755_v57 = vor.u32 %v3146_v41, %v2511_v42 }
  0x3d   : > { %v2917_v0 = vld [vmem:[%s3667_s7 + $0x240] sm:$0xf]  ;;  %v3251_v1 = vld [vmem:[%s3667_s7 + $0x24c] sm:$0xf0]  ;;  %v2790_v5 = vor.u32 %v3219_v63, %v2789_v61  ;;  %1469 = vmatpush.bf16.msra.mxu3 %v3062_v62  ;;  %v2743_v46 = vld [vmem:[%s3667_s7 + $0xf0] sm:$0xf0] }
  0x3e   : > { %v3045_v2 = vld [vmem:[%s3667_s7 + $0x340] sm:$0xf]  ;;  %v3283_v3 = vld [vmem:[%s3667_s7 + $0x34c] sm:$0xf0]  ;;  %v2918_v6 = vor.u32 %v3251_v1, %v2917_v0  ;;  %1323 = vmatpush.bf16.msra.mxu0 %v2662_v4  ;;  %v3237_v47 = vld [vmem:[%s3667_s7 + $0x1e4] sm:$0xf]  ;;  %v2746_v58 = vor.u32 %v3205_v45, %v2743_v46 }
  0x3f   : > { %v2645_v7 = vld [vmem:[%s3667_s7 + $0x20] sm:$0xf]  ;;  %v3183_v8 = vld [vmem:[%s3667_s7 + $0x2c] sm:$0xf0]  ;;  %v3046_v10 = vor.u32 %v3283_v3, %v3045_v2  ;;  %1372 = vmatpush.bf16.msra.mxu1 %v2790_v5  ;;  %v2871_v50 = vld [vmem:[%s3667_s7 + $0x1f0] sm:$0xf0] }
  0x40   : > { %v2773_v9 = vld [vmem:[%s3667_s7 + $0x120] sm:$0xf]  ;;  %v3215_v11 = vld [vmem:[%s3667_s7 + $0x12c] sm:$0xf0]  ;;  %v2646_v17 = vor.u32 %v3183_v8, %v2645_v7  ;;  %1421 = vmatpush.bf16.msra.mxu2 %v2918_v6  ;;  %v3265_v51 = vld [vmem:[%s3667_s7 + $0x2c4] sm:$0xf]  ;;  %v2874_v59 = vor.u32 %v3237_v47, %v2871_v50 }
  0x41   : > { %v2901_v12 = vld [vmem:[%s3667_s7 + $0x220] sm:$0xf]  ;;  %v3247_v13 = vld [vmem:[%s3667_s7 + $0x22c] sm:$0xf0]  ;;  %v2774_v21 = vor.u32 %v3215_v11, %v2773_v9  ;;  %1470 = vmatpush.bf16.msra.mxu3 %v3046_v10  ;;  %v2983_v52 = vld [vmem:[%s3667_s7 + $0x2d0] sm:$0xf0] }
  0x42   : > { %v3029_v14 = vld [vmem:[%s3667_s7 + $0x320] sm:$0xf]  ;;  %v3279_v15 = vld [vmem:[%s3667_s7 + $0x32c] sm:$0xf0]  ;;  %v2902_v22 = vor.u32 %v3247_v13, %v2901_v12  ;;  %1324 = vmatpush.bf16.msra.mxu0 %v2646_v17  ;;  %v3297_v55 = vld [vmem:[%s3667_s7 + $0x3c4] sm:$0xf]  ;;  %v2986_v60 = vor.u32 %v3265_v51, %v2983_v52 }
  0x43   : > { %v2629_v16 = vld [vmem:[%s3667_s7] sm:$0xf]  ;;  %v3179_v18 = vld [vmem:[%s3667_s7 + $0xc] sm:$0xf0]  ;;  %v3030_v26 = vor.u32 %v3279_v15, %v3029_v14  ;;  %1373 = vmatpush.bf16.msra.mxu1 %v2774_v21  ;;  %v3111_v56 = vld [vmem:[%s3667_s7 + $0x3d0] sm:$0xf0] }
  0x44   : > { %v2757_v19 = vld [vmem:[%s3667_s7 + $0x100] sm:$0xf]  ;;  %v3211_v20 = vld [vmem:[%s3667_s7 + $0x10c] sm:$0xf0]  ;;  %v2630_v34 = vor.u32 %v3179_v18, %v2629_v16  ;;  %1422 = vmatpush.bf16.msra.mxu2 %v2902_v22  ;;  %v3201_v61 = vld [vmem:[%s3667_s7 + $0xc4] sm:$0xf]  ;;  %v3114_v63 = vor.u32 %v3297_v55, %v3111_v56 }
  0x45   : > { %v2885_v23 = vld [vmem:[%s3667_s7 + $0x200] sm:$0xf]  ;;  %v3243_v24 = vld [vmem:[%s3667_s7 + $0x20c] sm:$0xf0]  ;;  %v2758_v38 = vor.u32 %v3211_v20, %v2757_v19  ;;  %1471 = vmatpush.bf16.msra.mxu3 %v3030_v26  ;;  %v2727_v62 = vld [vmem:[%s3667_s7 + $0xd0] sm:$0xf0] }
  0x46   : > { %v3013_v25 = vld [vmem:[%s3667_s7 + $0x300] sm:$0xf]  ;;  %v3275_v27 = vld [vmem:[%s3667_s7 + $0x30c] sm:$0xf0]  ;;  %v2886_v39 = vor.u32 %v3243_v24, %v2885_v23  ;;  %1325 = vmatpush.bf16.msra.mxu0 %v2630_v34  ;;  %v3233_v0 = vld [vmem:[%s3667_s7 + $0x1c4] sm:$0xf]  ;;  %v2730_v2 = vor.u32 %v3201_v61, %v2727_v62 }
  0x47   : > { %v2501_v28 = vld [vmem:[#allocation3] sm:$0xf]  ;;  %v3147_v29 = vld [vmem:[#allocation3 + $0xc] sm:$0xf0]  ;;  %v3014_v43 = vor.u32 %v3275_v27, %v3013_v25  ;;  %1374 = vmatpush.bf16.msra.mxu1 %v2758_v38  ;;  %v2855_v1 = vld [vmem:[%s3667_s7 + $0x1d0] sm:$0xf0] }
  0x48   : > { %v3744_v48 = vor.u32 %v3147_v29, %v2501_v28  ;;  %1423 = vmatpush.bf16.msra.mxu2 %v2886_v39  ;;  %v3261_v3 = vld [vmem:[%s3667_s7 + $0x2a4] sm:$0xf]  ;;  %v2967_v4 = vld [vmem:[%s3667_s7 + $0x2b0] sm:$0xf0]  ;;  %v2858_v6 = vor.u32 %v3233_v0, %v2855_v1  ;;  %v2517_v16 = vld [vmem:[#allocation3 + $0x20] sm:$0xf] }
  0x49   : > { %1472 = vmatpush.bf16.msra.mxu3 %v3014_v43  ;;  %v3293_v5 = vld [vmem:[%s3667_s7 + $0x3a4] sm:$0xf]  ;;  %v2970_v7 = vor.u32 %v3261_v3, %v2967_v4  ;;  %v3095_v8 = vld [vmem:[%s3667_s7 + $0x3b0] sm:$0xf0]  ;;  %v3151_v17 = vld [vmem:[#allocation3 + $0x2c] sm:$0xf0] }
  0x4a   : > { %1326 = vmatmul.bf16.vlgmr.msra.gmra.mxu0 %v3744_v48  ;;  %1375 = vmatmul.bf16.vlgmr.msra.gmra.mxu1 %v3749_v53  ;;  %v3197_v9 = vld [vmem:[%s3667_s7 + $0xa4] sm:$0xf]  ;;  %v2711_v10 = vld [vmem:[%s3667_s7 + $0xb0] sm:$0xf0]  ;;  %v3098_v11 = vor.u32 %v3293_v5, %v3095_v8  ;;  %v2525_v20 = vld [vmem:[#allocation3 + $0x28] sm:$0xf]  ;;  %v3773_v24 = vor.u32 %v3151_v17, %v2517_v16 }
  0x4b   : > { %1424 = vmatmul.bf16.vlgmr.msra.gmra.mxu2 %v3751_v54  ;;  %1514 = vmatpush.bf16.msrb.mxu0 %v2746_v58  ;;  %v3229_v12 = vld [vmem:[%s3667_s7 + $0x1a4] sm:$0xf]  ;;  %v2839_v13 = vld [vmem:[%s3667_s7 + $0x1b0] sm:$0xf0]  ;;  %v2714_v14 = vor.u32 %v3197_v9, %v2711_v10  ;;  %v3152_v21 = vld [vmem:[#allocation3 + $0x34] sm:$0xf0] }
  0x4c   : > { %1612 = vmatpush.bf16.msrb.mxu2 %v3002_v44  ;;  %1473 = vmatmul.bf16.vlgmr.msra.gmra.mxu3 %v3755_v57  ;;  %v2842_v15 = vor.u32 %v3229_v12, %v2839_v13  ;;  %v3149_v18 = vld [vmem:[#allocation3 + $0x24] sm:$0xf]  ;;  %v2519_v19 = vld [vmem:[#allocation3 + $0x30] sm:$0xf0]  ;;  %v3150_v22 = vld [vmem:[#allocation3 + $0x2c] sm:$0xf]  ;;  %v3777_v26 = vor.u32 %v3152_v21, %v2525_v20 }
  0x4d   : > { %1661 = vmatpush.bf16.msrb.mxu3 %v3130_v49  ;;  %1563 = vmatpush.bf16.msrb.mxu1 %v2874_v59  ;;  %v2527_v23 = vld [vmem:[#allocation3 + $0x38] sm:$0xf0]  ;;  %v3775_v25 = vor.u32 %v3149_v18, %v2519_v19  ;;  %v3257_v28 = vld [vmem:[%s3667_s7 + $0x284] sm:$0xf]  ;;  %v2951_v29 = vld [vmem:[%s3667_s7 + $0x290] sm:$0xf0] }
  0x4e   : > { %v3779_v27 = vor.u32 %v3150_v22, %v2527_v23  ;;  %v3289_v30 = vld [vmem:[%s3667_s7 + $0x384] sm:$0xf]  ;;  %v2954_v31 = vor.u32 %v3257_v28, %v2951_v29  ;;  %v3079_v32 = vld [vmem:[%s3667_s7 + $0x390] sm:$0xf0]  ;;  %v2533_v40 = vld [vmem:[#allocation3 + $0x40] sm:$0xf] }
  0x4f   : > { %1515 = vmatpush.bf16.msrb.mxu0 %v2730_v2  ;;  %v3193_v33 = vld [vmem:[%s3667_s7 + $0x84] sm:$0xf]  ;;  %v2695_v34 = vld [vmem:[%s3667_s7 + $0x90] sm:$0xf0]  ;;  %v3082_v35 = vor.u32 %v3289_v30, %v3079_v32  ;;  %v3155_v41 = vld [vmem:[#allocation3 + $0x4c] sm:$0xf0] }
  0x50   : > { %1613 = vmatpush.bf16.msrb.mxu2 %v2986_v60  ;;  %v2698_v36 = vor.u32 %v3193_v33, %v2695_v34  ;;  %v3225_v37 = vld [vmem:[%s3667_s7 + $0x184] sm:$0xf]  ;;  %v2823_v38 = vld [vmem:[%s3667_s7 + $0x190] sm:$0xf0]  ;;  %v2541_v44 = vld [vmem:[#allocation3 + $0x48] sm:$0xf]  ;;  %v3793_v49 = vor.u32 %v3155_v41, %v2533_v40 }
  0x51   : > { %1662 = vmatpush.bf16.msrb.mxu3 %v3114_v63  ;;  %1564 = vmatpush.bf16.msrb.mxu1 %v2858_v6  ;;  %v2826_v39 = vor.u32 %v3225_v37, %v2823_v38  ;;  %v3153_v42 = vld [vmem:[#allocation3 + $0x44] sm:$0xf]  ;;  %v2535_v43 = vld [vmem:[#allocation3 + $0x50] sm:$0xf0]  ;;  %v3156_v45 = vld [vmem:[#allocation3 + $0x54] sm:$0xf0] }
  0x52   : > { %v3154_v46 = vld [vmem:[#allocation3 + $0x4c] sm:$0xf]  ;;  %v2543_v47 = vld [vmem:[#allocation3 + $0x58] sm:$0xf0]  ;;  %v3795_v50 = vor.u32 %v3153_v42, %v2535_v43  ;;  %v3797_v51 = vor.u32 %v3156_v45, %v2541_v44  ;;  %v3253_v55 = vld [vmem:[%s3667_s7 + $0x264] sm:$0xf] }
  0x53   : > { %1516 = vmatpush.bf16.msrb.mxu0 %v2714_v14  ;;  %v3799_v52 = vor.u32 %v3154_v46, %v2543_v47  ;;  %v2935_v56 = vld [vmem:[%s3667_s7 + $0x270] sm:$0xf0]  ;;  %v3285_v58 = vld [vmem:[%s3667_s7 + $0x364] sm:$0xf]  ;;  %v2549_v4 = vld [vmem:[#allocation3 + $0x60] sm:$0xf] }
  0x54   : > { %1614 = vmatpush.bf16.msrb.mxu2 %v2970_v7  ;;  %v2938_v59 = vor.u32 %v3253_v55, %v2935_v56  ;;  %v3063_v60 = vld [vmem:[%s3667_s7 + $0x370] sm:$0xf0]  ;;  %v3189_v61 = vld [vmem:[%s3667_s7 + $0x64] sm:$0xf]  ;;  %v3159_v5 = vld [vmem:[#allocation3 + $0x6c] sm:$0xf0] }
  0x55   : > { %1663 = vmatpush.bf16.msrb.mxu3 %v3098_v11  ;;  %1565 = vmatpush.bf16.msrb.mxu1 %v2842_v15  ;;  %v2679_v62 = vld [vmem:[%s3667_s7 + $0x70] sm:$0xf0]  ;;  %v3066_v63 = vor.u32 %v3285_v58, %v3063_v60  ;;  %v3221_v1 = vld [vmem:[%s3667_s7 + $0x164] sm:$0xf]  ;;  %v2557_v8 = vld [vmem:[#allocation3 + $0x68] sm:$0xf]  ;;  %v3813_v12 = vor.u32 %v3159_v5, %v2549_v4 }
  0x56   : > { %v2682_v0 = vor.u32 %v3189_v61, %v2679_v62  ;;  %v2807_v2 = vld [vmem:[%s3667_s7 + $0x170] sm:$0xf0]  ;;  %v3157_v6 = vld [vmem:[#allocation3 + $0x64] sm:$0xf]  ;;  %v3160_v9 = vld [vmem:[#allocation3 + $0x74] sm:$0xf0] }
  0x57   : > { %1517 = vmatpush.bf16.msrb.mxu0 %v2698_v36  ;;  %v2810_v3 = vor.u32 %v3221_v1, %v2807_v2  ;;  %v2551_v7 = vld [vmem:[#allocation3 + $0x70] sm:$0xf0]  ;;  %v3158_v10 = vld [vmem:[#allocation3 + $0x6c] sm:$0xf]  ;;  %v2559_v11 = vld [vmem:[#allocation3 + $0x78] sm:$0xf0]  ;;  %v3817_v14 = vor.u32 %v3160_v9, %v2557_v8 }
  0x58   : > { %1615 = vmatpush.bf16.msrb.mxu2 %v2954_v31  ;;  %v3815_v13 = vor.u32 %v3157_v6, %v2551_v7  ;;  %v3819_v15 = vor.u32 %v3158_v10, %v2559_v11  ;;  %v3249_v16 = vld [vmem:[%s3667_s7 + $0x244] sm:$0xf]  ;;  %v2919_v17 = vld [vmem:[%s3667_s7 + $0x250] sm:$0xf0]  ;;  %v2565_v32 = vld [vmem:[#allocation3 + $0x80] sm:$0xf] }
  0x59   : > { %1664 = vmatpush.bf16.msrb.mxu3 %v3082_v35  ;;  %1566 = vmatpush.bf16.msrb.mxu1 %v2826_v39  ;;  %v3281_v18 = vld [vmem:[%s3667_s7 + $0x344] sm:$0xf]  ;;  %v2922_v19 = vor.u32 %v3249_v16, %v2919_v17  ;;  %v3047_v20 = vld [vmem:[%s3667_s7 + $0x350] sm:$0xf0]  ;;  %v3163_v33 = vld [vmem:[#allocation3 + $0x8c] sm:$0xf0] }
  0x5a   : > { %1331 = vmatmul.bf16.gmra.mxu0 %v3773_v24  ;;  %1380 = vmatmul.bf16.gmra.mxu1 %v3775_v25  ;;  %v3185_v21 = vld [vmem:[%s3667_s7 + $0x44] sm:$0xf]  ;;  %v2663_v22 = vld [vmem:[%s3667_s7 + $0x50] sm:$0xf0]  ;;  %v3050_v23 = vor.u32 %v3281_v18, %v3047_v20  ;;  %v2573_v36 = vld [vmem:[#allocation3 + $0x88] sm:$0xf]  ;;  %v3833_v40 = vor.u32 %v3163_v33, %v2565_v32 }
  0x5b   : > { %1429 = vmatmul.bf16.gmra.mxu2 %v3777_v26  ;;  %1518 = vmatpush.bf16.msrb.mxu0 %v2682_v0  ;;  %v2666_v28 = vor.u32 %v3185_v21, %v2663_v22  ;;  %v3217_v29 = vld [vmem:[%s3667_s7 + $0x144] sm:$0xf]  ;;  %v2791_v30 = vld [vmem:[%s3667_s7 + $0x150] sm:$0xf0]  ;;  %v3164_v37 = vld [vmem:[#allocation3 + $0x94] sm:$0xf0] }
  0x5c   : > { %1478 = vmatmul.bf16.gmra.mxu3 %v3779_v27  ;;  %1616 = vmatpush.bf16.msrb.mxu2 %v2938_v59  ;;  %v2794_v31 = vor.u32 %v3217_v29, %v2791_v30  ;;  %v3161_v34 = vld [vmem:[#allocation3 + $0x84] sm:$0xf]  ;;  %v2567_v35 = vld [vmem:[#allocation3 + $0x90] sm:$0xf0]  ;;  %v3162_v38 = vld [vmem:[#allocation3 + $0x8c] sm:$0xf]  ;;  %v3837_v42 = vor.u32 %v3164_v37, %v2573_v36 }
  0x5d   : > { %1665 = vmatpush.bf16.msrb.mxu3 %v3066_v63  ;;  %1567 = vmatpush.bf16.msrb.mxu1 %v2810_v3  ;;  %v2575_v39 = vld [vmem:[#allocation3 + $0x98] sm:$0xf0]  ;;  %v3835_v41 = vor.u32 %v3161_v34, %v2567_v35  ;;  %v3245_v44 = vld [vmem:[%s3667_s7 + $0x224] sm:$0xf]  ;;  %v2903_v45 = vld [vmem:[%s3667_s7 + $0x230] sm:$0xf0] }
  0x5e   : > { %v3839_v43 = vor.u32 %v3162_v38, %v2575_v39  ;;  %v3277_v46 = vld [vmem:[%s3667_s7 + $0x324] sm:$0xf]  ;;  %v2906_v47 = vor.u32 %v3245_v44, %v2903_v45  ;;  %v3031_v55 = vld [vmem:[%s3667_s7 + $0x330] sm:$0xf0]  ;;  %v2581_v0 = vld [vmem:[#allocation3 + $0xa0] sm:$0xf] }
  0x5f   : > { %1519 = vmatpush.bf16.msrb.mxu0 %v2666_v28  ;;  %v3181_v56 = vld [vmem:[%s3667_s7 + $0x24] sm:$0xf]  ;;  %v2647_v58 = vld [vmem:[%s3667_s7 + $0x30] sm:$0xf0]  ;;  %v3034_v59 = vor.u32 %v3277_v46, %v3031_v55  ;;  %v3167_v1 = vld [vmem:[#allocation3 + $0xac] sm:$0xf0] }
  0x60   : > { %1617 = vmatpush.bf16.msrb.mxu2 %v2922_v19  ;;  %v2650_v60 = vor.u32 %v3181_v56, %v2647_v58  ;;  %v3213_v61 = vld [vmem:[%s3667_s7 + $0x124] sm:$0xf]  ;;  %v2775_v62 = vld [vmem:[%s3667_s7 + $0x130] sm:$0xf0]  ;;  %v2589_v4 = vld [vmem:[#allocation3 + $0xa8] sm:$0xf]  ;;  %v3853_v8 = vor.u32 %v3167_v1, %v2581_v0 }
  0x61   : > { %1666 = vmatpush.bf16.msrb.mxu3 %v3050_v23  ;;  %1568 = vmatpush.bf16.msrb.mxu1 %v2794_v31  ;;  %v2778_v63 = vor.u32 %v3213_v61, %v2775_v62  ;;  %v3165_v2 = vld [vmem:[#allocation3 + $0xa4] sm:$0xf]  ;;  %v2583_v3 = vld [vmem:[#allocation3 + $0xb0] sm:$0xf0]  ;;  %v3168_v5 = vld [vmem:[#allocation3 + $0xb4] sm:$0xf0] }
  0x62   : > { %v3166_v6 = vld [vmem:[#allocation3 + $0xac] sm:$0xf]  ;;  %v2591_v7 = vld [vmem:[#allocation3 + $0xb8] sm:$0xf0]  ;;  %v3855_v9 = vor.u32 %v3165_v2, %v2583_v3  ;;  %v3857_v10 = vor.u32 %v3168_v5, %v2589_v4  ;;  %v3241_v16 = vld [vmem:[%s3667_s7 + $0x204] sm:$0xf] }
  0x63   : > { %1520 = vmatpush.bf16.msrb.mxu0 %v2650_v60  ;;  %v3859_v11 = vor.u32 %v3166_v6, %v2591_v7  ;;  %v2887_v17 = vld [vmem:[%s3667_s7 + $0x210] sm:$0xf0]  ;;  %v3273_v18 = vld [vmem:[%s3667_s7 + $0x304] sm:$0xf]  ;;  %v2597_v32 = vld [vmem:[#allocation3 + $0xc0] sm:$0xf] }
  0x64   : > { %1618 = vmatpush.bf16.msrb.mxu2 %v2906_v47  ;;  %v2890_v19 = vor.u32 %v3241_v16, %v2887_v17  ;;  %v3015_v20 = vld [vmem:[%s3667_s7 + $0x310] sm:$0xf0]  ;;  %v3177_v21 = vld [vmem:[%s3667_s7 + $0x4] sm:$0xf]  ;;  %v3171_v33 = vld [vmem:[#allocation3 + $0xcc] sm:$0xf0] }
  0x65   : > { %1667 = vmatpush.bf16.msrb.mxu3 %v3034_v59  ;;  %1569 = vmatpush.bf16.msrb.mxu1 %v2778_v63  ;;  %v2631_v22 = vld [vmem:[%s3667_s7 + $0x10] sm:$0xf0]  ;;  %v3018_v23 = vor.u32 %v3273_v18, %v3015_v20  ;;  %v3209_v29 = vld [vmem:[%s3667_s7 + $0x104] sm:$0xf]  ;;  %v2605_v36 = vld [vmem:[#allocation3 + $0xc8] sm:$0xf]  ;;  %v3873_v44 = vor.u32 %v3171_v33, %v2597_v32 }
  0x66   : > { %v2634_v28 = vor.u32 %v3177_v21, %v2631_v22  ;;  %v2759_v30 = vld [vmem:[%s3667_s7 + $0x110] sm:$0xf0]  ;;  %v3169_v34 = vld [vmem:[#allocation3 + $0xc4] sm:$0xf]  ;;  %v3172_v37 = vld [vmem:[#allocation3 + $0xd4] sm:$0xf0] }
  0x67   : > { %v2762_v31 = vor.u32 %v3209_v29, %v2759_v30  ;;  %v2599_v35 = vld [vmem:[#allocation3 + $0xd0] sm:$0xf0]  ;;  %v3170_v38 = vld [vmem:[#allocation3 + $0xcc] sm:$0xf]  ;;  %v2607_v39 = vld [vmem:[#allocation3 + $0xd8] sm:$0xf0]  ;;  %v3877_v46 = vor.u32 %v3172_v37, %v2605_v36 }
  0x68   : > { %1619 = vmatpush.bf16.msrb.mxu2 %v2890_v19  ;;  %1521 = vmatpush.bf16.msrb.mxu0 %v2634_v28  ;;  %v3875_v45 = vor.u32 %v3169_v34, %v2599_v35  ;;  %v3879_v47 = vor.u32 %v3170_v38, %v2607_v39  ;;  %v3005_v55 = vld [vmem:[%s3667_s7 + $0x2e8] sm:$0xf]  ;;  %v3272_v56 = vld [vmem:[%s3667_s7 + $0x2f4] sm:$0xf0]  ;;  %v2613_v3 = vld [vmem:[#allocation3 + $0xe0] sm:$0xf] }
  0x69   : > { %1668 = vmatpush.bf16.msrb.mxu3 %v3018_v23  ;;  %1570 = vmatpush.bf16.msrb.mxu1 %v2762_v31  ;;  %v3133_v58 = vld [vmem:[%s3667_s7 + $0x3e8] sm:$0xf]  ;;  %v3006_v59 = vor.u32 %v3272_v56, %v3005_v55  ;;  %v3304_v60 = vld [vmem:[%s3667_s7 + $0x3f4] sm:$0xf0]  ;;  %v3175_v4 = vld [vmem:[#allocation3 + $0xec] sm:$0xf0] }
  0x6a   : > { %1336 = vmatmul.bf16.gmra.mxu0 %v3793_v49  ;;  %1385 = vmatmul.bf16.gmra.mxu1 %v3795_v50  ;;  %v3134_v61 = vor.u32 %v3304_v60, %v3133_v58  ;;  %v2749_v62 = vld [vmem:[%s3667_s7 + $0xe8] sm:$0xf]  ;;  %v3208_v63 = vld [vmem:[%s3667_s7 + $0xf4] sm:$0xf0]  ;;  %v3173_v5 = vld [vmem:[#allocation3 + $0xe4] sm:$0xf]  ;;  %v3893_v20 = vor.u32 %v3175_v4, %v2613_v3 }
  0x6b   : > { %1434 = vmatmul.bf16.gmra.mxu2 %v3797_v51  ;;  %v2877_v0 = vld [vmem:[%s3667_s7 + $0x1e8] sm:$0xf]  ;;  %v2750_v1 = vor.u32 %v3208_v63, %v2749_v62  ;;  %v3240_v2 = vld [vmem:[%s3667_s7 + $0x1f4] sm:$0xf0]  ;;  %v2615_v7 = vld [vmem:[#allocation3 + $0xf0] sm:$0xf0] }
  0x6c   : > { %1483 = vmatmul.bf16.gmra.mxu3 %v3799_v52  ;;  %1808 = vmatpush.bf16.msra.mxu2 %v3006_v59  ;;  %v2878_v6 = vor.u32 %v3240_v2, %v2877_v0  ;;  %v2621_v16 = vld [vmem:[#allocation3 + $0xe8] sm:$0xf]  ;;  %v3176_v17 = vld [vmem:[#allocation3 + $0xf4] sm:$0xf0]  ;;  %v3174_v18 = vld [vmem:[#allocation3 + $0xec] sm:$0xf]  ;;  %v3895_v21 = vor.u32 %v3173_v5, %v2615_v7 }
  0x6d   : > { %1857 = vmatpush.bf16.msra.mxu3 %v3134_v61  ;;  %1710 = vmatpush.bf16.msra.mxu0 %v2750_v1  ;;  %v2623_v19 = vld [vmem:[#allocation3 + $0xf8] sm:$0xf0]  ;;  %v3897_v22 = vor.u32 %v3176_v17, %v2621_v16  ;;  %v2989_v28 = vld [vmem:[%s3667_s7 + $0x2c8] sm:$0xf]  ;;  %v3268_v29 = vld [vmem:[%s3667_s7 + $0x2d4] sm:$0xf0] }
  0x6e   : > { %1759 = vmatpush.bf16.msra.mxu1 %v2878_v6  ;;  %v3899_v23 = vor.u32 %v3174_v18, %v2623_v19  ;;  %v3117_v30 = vld [vmem:[%s3667_s7 + $0x3c8] sm:$0xf]  ;;  %v2990_v31 = vor.u32 %v3268_v29, %v2989_v28  ;;  %v3300_v32 = vld [vmem:[%s3667_s7 + $0x3d4] sm:$0xf0] }
  0x6f   : > { %v3118_v33 = vor.u32 %v3300_v32, %v3117_v30  ;;  %v2733_v34 = vld [vmem:[%s3667_s7 + $0xc8] sm:$0xf]  ;;  %v3204_v35 = vld [vmem:[%s3667_s7 + $0xd4] sm:$0xf0] }
  0x70   : > { %4305 = vst [vmem:[#allocation12_spill] sm:$0xff] %v3899_v23  ;;  %1809 = vmatpush.bf16.msra.mxu2 %v2990_v31  ;;  %v2861_v36 = vld [vmem:[%s3667_s7 + $0x1c8] sm:$0xf]  ;;  %v2734_v37 = vor.u32 %v3204_v35, %v2733_v34  ;;  %v3236_v38 = vld [vmem:[%s3667_s7 + $0x1d4] sm:$0xf0] }
  0x71   : > { %1858 = vmatpush.bf16.msra.mxu3 %v3118_v33  ;;  %v2862_v39 = vor.u32 %v3236_v38, %v2861_v36  ;;  %v2973_v59 = vld [vmem:[%s3667_s7 + $0x2a8] sm:$0xf]  ;;  %v3264_v60 = vld [vmem:[%s3667_s7 + $0x2b4] sm:$0xf0] }
  0x72   : > { %1711 = vmatpush.bf16.msra.mxu0 %v2734_v37  ;;  %v3101_v61 = vld [vmem:[%s3667_s7 + $0x3a8] sm:$0xf]  ;;  %v2974_v62 = vor.u32 %v3264_v60, %v2973_v59  ;;  %v3296_v63 = vld [vmem:[%s3667_s7 + $0x3b4] sm:$0xf0] }
  0x73   : > { %1760 = vmatpush.bf16.msra.mxu1 %v2862_v39  ;;  %v3102_v1 = vor.u32 %v3296_v63, %v3101_v61  ;;  %v2717_v16 = vld [vmem:[%s3667_s7 + $0xa8] sm:$0xf]  ;;  %v3200_v17 = vld [vmem:[%s3667_s7 + $0xb4] sm:$0xf0] }
  0x74   : > { %1810 = vmatpush.bf16.msra.mxu2 %v2974_v62  ;;  %v2845_v18 = vld [vmem:[%s3667_s7 + $0x1a8] sm:$0xf]  ;;  %v2718_v19 = vor.u32 %v3200_v17, %v2717_v16  ;;  %v3232_v28 = vld [vmem:[%s3667_s7 + $0x1b4] sm:$0xf0] }
  0x75   : > { %1859 = vmatpush.bf16.msra.mxu3 %v3102_v1  ;;  %v2846_v29 = vor.u32 %v3232_v28, %v2845_v18  ;;  %v2957_v37 = vld [vmem:[%s3667_s7 + $0x288] sm:$0xf]  ;;  %v3260_v38 = vld [vmem:[%s3667_s7 + $0x294] sm:$0xf0] }
  0x76   : > { %1712 = vmatpush.bf16.msra.mxu0 %v2718_v19  ;;  %v3085_v39 = vld [vmem:[%s3667_s7 + $0x388] sm:$0xf] }
  0x77   : > { %1761 = vmatpush.bf16.msra.mxu1 %v2846_v29 }
  0x7a   : > { %1341 = vmatmul.bf16.gmra.mxu0 %v3813_v12  ;;  %1390 = vmatmul.bf16.gmra.mxu1 %v3815_v13 }
  0x7b   : > { %1439 = vmatmul.bf16.gmra.mxu2 %v3817_v14 }
  0x7c   : > { %1488 = vmatmul.bf16.gmra.mxu3 %v3819_v15 }
  0x8a   : > { %1346 = vmatmul.bf16.gmra.mxu0 %v3833_v40  ;;  %1395 = vmatmul.bf16.gmra.mxu1 %v3835_v41 }
  0x8b   : > { %1444 = vmatmul.bf16.gmra.mxu2 %v3837_v42 }
  0x8c   : > { %1493 = vmatmul.bf16.gmra.mxu3 %v3839_v43 }
  0x9a   : > { %1351 = vmatmul.bf16.gmra.mxu0 %v3853_v8  ;;  %1400 = vmatmul.bf16.gmra.mxu1 %v3855_v9 }
  0x9b   : > { %1449 = vmatmul.bf16.gmra.mxu2 %v3857_v10 }
  0x9c   : > { %1498 = vmatmul.bf16.gmra.mxu3 %v3859_v11 }
  0xaa   : > { %1356 = vmatmul.bf16.gmra.mxu0 %v3873_v44  ;;  %1405 = vmatmul.bf16.gmra.mxu1 %v3875_v45 }
  0xab   : > { %1454 = vmatmul.bf16.gmra.mxu2 %v3877_v46 }
  0xac   : > { %1503 = vmatmul.bf16.gmra.mxu3 %v3879_v47 }
  0xba   : > { %1361 = vmatmul.bf16.gmra.mxu0 %v3893_v20  ;;  %1410 = vmatmul.bf16.gmra.mxu1 %v3895_v21 }
  0xbb   : > { %1459 = vmatmul.bf16.gmra.mxu2 %v3897_v22 }
  0xbc   : > { %1508 = vmatmul.bf16.gmra.mxu3 %v3899_v23 }
  0xc7   : > { %v1327_v55 = vpop.f32.mrf.mxu0  ;;  %v1376_v56 = vpop.f32.mrf.mxu1 }
  0xc8   : > { %v1377_v58 = vadd.f32 %v1376_v56, %v1327_v55  ;;  %v2958_v55 = vor.u32 %v3260_v38, %v2957_v37  ;;  %v3292_v56 = vld [vmem:[%s3667_s7 + $0x394] sm:$0xf0] }
  0xc9   : > { %v3086_v59 = vor.u32 %v3292_v56, %v3085_v39  ;;  %v3288_v37 = vld [vmem:[%s3667_s7 + $0x374] sm:$0xf0] }
  0xca   : > { %1522 = vmatmul.bf16.vlgmr.msrb.gmra.mxu0 %v3744_v48  ;;  %1571 = vmatmul.bf16.vlgmr.msrb.gmra.mxu1 %v3749_v53 }
  0xcb   : > { %1620 = vmatmul.bf16.vlgmr.msrb.gmra.mxu2 %v3751_v54  ;;  %1860 = vmatpush.bf16.msra.mxu3 %v3086_v59 }
  0xcc   : > { %1669 = vmatmul.bf16.vlgmr.msrb.gmra.mxu3 %v3755_v57  ;;  %1811 = vmatpush.bf16.msra.mxu2 %v2958_v55 }
  0xce   : > { %v1425_v0 = vpop.f32.mrf.mxu2 }
  0xcf   : > { %v1426_v2 = vadd.f32 %v1425_v0, %v1377_v58  ;;  %v1474_v3 = vpop.f32.mrf.mxu3  ;;  %v1329_v4 = vpop.f32.mrf.mxu0 }
  0xd0   : > { %v1378_v5 = vpop.f32.mrf.mxu1 }
  0xd1   : > { %v3921_v6 = vadd.f32 %v1474_v3, %v1426_v2  ;;  %v1379_v7 = vadd.f32 %v1378_v5, %v1329_v4  ;;  %v2701_v2 = vld [vmem:[%s3667_s7 + $0x88] sm:$0xf]  ;;  %v3196_v3 = vld [vmem:[%s3667_s7 + $0x94] sm:$0xf0] }
  0xd2   : > { %v2829_v4 = vld [vmem:[%s3667_s7 + $0x188] sm:$0xf]  ;;  %v2702_v5 = vor.u32 %v3196_v3, %v2701_v2  ;;  %v3224_v3 = vld [vmem:[%s3667_s7 + $0x174] sm:$0xf0] }
  0xd4   : > { %1713 = vmatpush.bf16.msra.mxu0 %v2702_v5 }
  0xd6   : > { %v1427_v30 = vpop.f32.mrf.mxu2 }
  0xd7   : > { %v1428_v31 = vadd.f32 %v1427_v30, %v1379_v7  ;;  %v1476_v32 = vpop.f32.mrf.mxu3  ;;  %v1332_v33 = vpop.f32.mrf.mxu0  ;;  %v3228_v7 = vld [vmem:[%s3667_s7 + $0x194] sm:$0xf0] }
  0xd8   : > { %v1381_v34 = vpop.f32.mrf.mxu1  ;;  %v2830_v16 = vor.u32 %v3228_v7, %v2829_v4 }
  0xd9   : > { %v3927_v35 = vadd.f32 %v1476_v32, %v1428_v31  ;;  %v1382_v36 = vadd.f32 %v1381_v34, %v1332_v33  ;;  %v2941_v32 = vld [vmem:[%s3667_s7 + $0x268] sm:$0xf]  ;;  %v3256_v33 = vld [vmem:[%s3667_s7 + $0x274] sm:$0xf0] }
  0xda   : > { %1527 = vmatmul.bf16.gmra.mxu0 %v3773_v24  ;;  %1576 = vmatmul.bf16.gmra.mxu1 %v3775_v25  ;;  %v3069_v34 = vld [vmem:[%s3667_s7 + $0x368] sm:$0xf] }
  0xdb   : > { %1625 = vmatmul.bf16.gmra.mxu2 %v3777_v26  ;;  %1762 = vmatpush.bf16.msra.mxu1 %v2830_v16  ;;  %v3070_v39 = vor.u32 %v3288_v37, %v3069_v34  ;;  %v3284_v34 = vld [vmem:[%s3667_s7 + $0x354] sm:$0xf0] }
  0xdc   : > { %1674 = vmatmul.bf16.gmra.mxu3 %v3779_v27 }
  0xdd   : > { %1861 = vmatpush.bf16.msra.mxu3 %v3070_v39 }
  0xde   : > { %v1430_v58 = vpop.f32.mrf.mxu2 }
  0xdf   : > { %v1431_v60 = vadd.f32 %v1430_v58, %v1382_v36  ;;  %v1479_v61 = vpop.f32.mrf.mxu3  ;;  %v1334_v62 = vpop.f32.mrf.mxu0  ;;  %v2942_v36 = vor.u32 %v3256_v33, %v2941_v32  ;;  %v3053_v32 = vld [vmem:[%s3667_s7 + $0x348] sm:$0xf] }
  0xe0   : > { %v1383_v63 = vpop.f32.mrf.mxu1  ;;  %v3054_v37 = vor.u32 %v3284_v34, %v3053_v32  ;;  %v3037_v32 = vld [vmem:[%s3667_s7 + $0x328] sm:$0xf]  ;;  %v3280_v34 = vld [vmem:[%s3667_s7 + $0x334] sm:$0xf0] }
  0xe1   : > { %v3937_v0 = vadd.f32 %v1479_v61, %v1431_v60  ;;  %v1384_v1 = vadd.f32 %v1383_v63, %v1334_v62  ;;  %1812 = vmatpush.bf16.msra.mxu2 %v2942_v36  ;;  %v2685_v62 = vld [vmem:[%s3667_s7 + $0x68] sm:$0xf]  ;;  %v3192_v63 = vld [vmem:[%s3667_s7 + $0x74] sm:$0xf0] }
  0xe2   : > { %v2686_v2 = vor.u32 %v3192_v63, %v2685_v62  ;;  %1862 = vmatpush.bf16.msra.mxu3 %v3054_v37  ;;  %v3188_v62 = vld [vmem:[%s3667_s7 + $0x54] sm:$0xf0]  ;;  %v2797_v63 = vld [vmem:[%s3667_s7 + $0x148] sm:$0xf]  ;;  %v3038_v37 = vor.u32 %v3280_v34, %v3037_v32 }
  0xe3   : > { %v2893_v32 = vld [vmem:[%s3667_s7 + $0x208] sm:$0xf] }
  0xe4   : > { %1714 = vmatpush.bf16.msra.mxu0 %v2686_v2  ;;  %v3220_v2 = vld [vmem:[%s3667_s7 + $0x154] sm:$0xf0]  ;;  %v3021_v34 = vld [vmem:[%s3667_s7 + $0x308] sm:$0xf] }
  0xe6   : > { %v1432_v17 = vpop.f32.mrf.mxu2  ;;  %1863 = vmatpush.bf16.msra.mxu3 %v3038_v37  ;;  %v3276_v37 = vld [vmem:[%s3667_s7 + $0x314] sm:$0xf0] }
  0xe7   : > { %v1433_v18 = vadd.f32 %v1432_v17, %v1384_v1  ;;  %v1481_v19 = vpop.f32.mrf.mxu3  ;;  %v1337_v28 = vpop.f32.mrf.mxu0  ;;  %v2813_v1 = vld [vmem:[%s3667_s7 + $0x168] sm:$0xf] }
  0xe8   : > { %v1386_v29 = vpop.f32.mrf.mxu1  ;;  %v2814_v4 = vor.u32 %v3224_v3, %v2813_v1  ;;  %v2798_v3 = vor.u32 %v3220_v2, %v2797_v63  ;;  %v3184_v63 = vld [vmem:[%s3667_s7 + $0x34] sm:$0xf0] }
  0xe9   : > { %v3943_v30 = vadd.f32 %v1481_v19, %v1433_v18  ;;  %v1387_v31 = vadd.f32 %v1386_v29, %v1337_v28  ;;  %v2925_v29 = vld [vmem:[%s3667_s7 + $0x248] sm:$0xf] }
  0xea   : > { %1532 = vmatmul.bf16.gmra.mxu0 %v3793_v49  ;;  %1581 = vmatmul.bf16.gmra.mxu1 %v3795_v50 }
  0xeb   : > { %1630 = vmatmul.bf16.gmra.mxu2 %v3797_v51  ;;  %1763 = vmatpush.bf16.msra.mxu1 %v2814_v4 }
  0xec   : > { %1679 = vmatmul.bf16.gmra.mxu3 %v3799_v52 }
  0xee   : > { %v1435_v38 = vpop.f32.mrf.mxu2 }
  0xef   : > { %v1436_v55 = vadd.f32 %v1435_v38, %v1387_v31  ;;  %v1484_v56 = vpop.f32.mrf.mxu3  ;;  %v1339_v58 = vpop.f32.mrf.mxu0  ;;  %v3252_v31 = vld [vmem:[%s3667_s7 + $0x254] sm:$0xf0]  ;;  %1764 = vmatpush.bf16.msra.mxu1 %v2798_v3 }
  0xf0   : > { %v1388_v59 = vpop.f32.mrf.mxu1  ;;  %v2926_v33 = vor.u32 %v3252_v31, %v2925_v29  ;;  %v2909_v29 = vld [vmem:[%s3667_s7 + $0x228] sm:$0xf]  ;;  %v3248_v31 = vld [vmem:[%s3667_s7 + $0x234] sm:$0xf0] }
  0xf1   : > { %v3953_v60 = vadd.f32 %v1484_v56, %v1436_v55  ;;  %v1389_v61 = vadd.f32 %v1388_v59, %v1339_v58  ;;  %v3216_v3 = vld [vmem:[%s3667_s7 + $0x134] sm:$0xf0] }
  0xf2   : > { %1813 = vmatpush.bf16.msra.mxu2 %v2926_v33  ;;  %v2910_v33 = vor.u32 %v3248_v31, %v2909_v29 }
  0xf6   : > { %v1437_v5 = vpop.f32.mrf.mxu2  ;;  %1814 = vmatpush.bf16.msra.mxu2 %v2910_v33  ;;  %v3244_v33 = vld [vmem:[%s3667_s7 + $0x214] sm:$0xf0] }
  0xf7   : > { %v1438_v7 = vadd.f32 %v1437_v5, %v1389_v61  ;;  %v1486_v16 = vpop.f32.mrf.mxu3  ;;  %v1342_v17 = vpop.f32.mrf.mxu0  ;;  %v2669_v61 = vld [vmem:[%s3667_s7 + $0x48] sm:$0xf] }
  0xf8   : > { %v1391_v18 = vpop.f32.mrf.mxu1  ;;  %v2670_v1 = vor.u32 %v3188_v62, %v2669_v61  ;;  %v2653_v62 = vld [vmem:[%s3667_s7 + $0x28] sm:$0xf] }
  0xf9   : > { %v3959_v19 = vadd.f32 %v1486_v16, %v1438_v7  ;;  %v1392_v28 = vadd.f32 %v1391_v18, %v1342_v17  ;;  %v2654_v2 = vor.u32 %v3184_v63, %v2653_v62 }
  0xfa   : > { %1537 = vmatmul.bf16.gmra.mxu0 %v3813_v12  ;;  %1586 = vmatmul.bf16.gmra.mxu1 %v3815_v13 }
  0xfb   : > { %1635 = vmatmul.bf16.gmra.mxu2 %v3817_v14  ;;  %1715 = vmatpush.bf16.msra.mxu0 %v2670_v1  ;;  %v2781_v1 = vld [vmem:[%s3667_s7 + $0x128] sm:$0xf] }
  0xfc   : > { %1684 = vmatmul.bf16.gmra.mxu3 %v3819_v15 }
  0xfe   : > { %v1440_v36 = vpop.f32.mrf.mxu2 }
  0xff   : > { %v1441_v38 = vadd.f32 %v1440_v36, %v1392_v28  ;;  %v1489_v39 = vpop.f32.mrf.mxu3  ;;  %v1344_v55 = vpop.f32.mrf.mxu0  ;;  %1716 = vmatpush.bf16.msra.mxu0 %v2654_v2  ;;  %v2637_v2 = vld [vmem:[%s3667_s7 + $0x8] sm:$0xf] }
 0x100   : > { %v1393_v56 = vpop.f32.mrf.mxu1 }
 0x101   : > { %v3969_v58 = vadd.f32 %v1489_v39, %v1441_v38  ;;  %v1394_v59 = vadd.f32 %v1393_v56, %v1344_v55 }
 0x106   : > { %v1442_v4 = vpop.f32.mrf.mxu2 }
 0x107   : > { %v1443_v5 = vadd.f32 %v1442_v4, %v1394_v59  ;;  %v1491_v7 = vpop.f32.mrf.mxu3  ;;  %v1347_v16 = vpop.f32.mrf.mxu0  ;;  %v2782_v4 = vor.u32 %v3216_v3, %v2781_v1  ;;  %v3180_v3 = vld [vmem:[%s3667_s7 + $0x14] sm:$0xf0] }
 0x108   : > { %v1396_v17 = vpop.f32.mrf.mxu1 }
 0x109   : > { %v3975_v18 = vadd.f32 %v1491_v7, %v1443_v5  ;;  %v1397_v28 = vadd.f32 %v1396_v17, %v1347_v16  ;;  %1765 = vmatpush.bf16.msra.mxu1 %v2782_v4  ;;  %v2765_v4 = vld [vmem:[%s3667_s7 + $0x108] sm:$0xf] }
 0x10a   : > { %1542 = vmatmul.bf16.gmra.mxu0 %v3833_v40  ;;  %1591 = vmatmul.bf16.gmra.mxu1 %v3835_v41 }
 0x10b   : > { %1640 = vmatmul.bf16.gmra.mxu2 %v3837_v42 }
 0x10c   : > { %1689 = vmatmul.bf16.gmra.mxu3 %v3839_v43 }
 0x10e   : > { %v1445_v36 = vpop.f32.mrf.mxu2 }
 0x10f   : > { %v1446_v38 = vadd.f32 %v1445_v36, %v1397_v28  ;;  %v1494_v39 = vpop.f32.mrf.mxu3  ;;  %v1349_v55 = vpop.f32.mrf.mxu0  ;;  %v2894_v36 = vor.u32 %v3244_v33, %v2893_v32 }
 0x110   : > { %v1398_v56 = vpop.f32.mrf.mxu1 }
 0x111   : > { %v3985_v59 = vadd.f32 %v1494_v39, %v1446_v38  ;;  %v1399_v61 = vadd.f32 %v1398_v56, %v1349_v55  ;;  %v3022_v39 = vor.u32 %v3276_v37, %v3021_v34  ;;  %1815 = vmatpush.bf16.msra.mxu2 %v2894_v36  ;;  %v3270_v37 = vld [vmem:[%s3667_s7 + $0x2ec] sm:$0xf] }
 0x113   : > { %1864 = vmatpush.bf16.msra.mxu3 %v3022_v39  ;;  %v3302_v39 = vld [vmem:[%s3667_s7 + $0x3ec] sm:$0xf] }
 0x116   : > { %v1447_v5 = vpop.f32.mrf.mxu2 }
 0x117   : > { %v1448_v7 = vadd.f32 %v1447_v5, %v1399_v61  ;;  %v1496_v16 = vpop.f32.mrf.mxu3  ;;  %v1352_v17 = vpop.f32.mrf.mxu0  ;;  %v2638_v5 = vor.u32 %v3180_v3, %v2637_v2 }
 0x118   : > { %v1401_v28 = vpop.f32.mrf.mxu1 }
 0x119   : > { %v3991_v29 = vadd.f32 %v1496_v16, %v1448_v7  ;;  %v1402_v31 = vadd.f32 %v1401_v28, %v1352_v17  ;;  %v3212_v7 = vld [vmem:[%s3667_s7 + $0x114] sm:$0xf0]  ;;  %1717 = vmatpush.bf16.msra.mxu0 %v2638_v5 }
 0x11a   : > { %1547 = vmatmul.bf16.gmra.mxu0 %v3853_v8  ;;  %1596 = vmatmul.bf16.gmra.mxu1 %v3855_v9  ;;  %v2766_v16 = vor.u32 %v3212_v7, %v2765_v4 }
 0x11b   : > { %1645 = vmatmul.bf16.gmra.mxu2 %v3857_v10 }
 0x11c   : > { %1694 = vmatmul.bf16.gmra.mxu3 %v3859_v11  ;;  %1766 = vmatpush.bf16.msra.mxu1 %v2766_v16  ;;  %v3206_v16 = vld [vmem:[%s3667_s7 + $0xec] sm:$0xf] }
 0x11e   : > { %v1450_v38 = vpop.f32.mrf.mxu2 }
 0x11f   : > { %v1451_v55 = vadd.f32 %v1450_v38, %v1402_v31  ;;  %v1499_v56 = vpop.f32.mrf.mxu3  ;;  %v1354_v61 = vpop.f32.mrf.mxu0  ;;  %v3007_v38 = vld [vmem:[%s3667_s7 + $0x2f8] sm:$0xf0] }
 0x120   : > { %v1403_v62 = vpop.f32.mrf.mxu1 }
 0x121   : > { %v4001_v63 = vadd.f32 %v1499_v56, %v1451_v55  ;;  %v1404_v1 = vadd.f32 %v1403_v62, %v1354_v61  ;;  %v3010_v55 = vor.u32 %v3270_v37, %v3007_v38  ;;  %v3135_v56 = vld [vmem:[%s3667_s7 + $0x3f8] sm:$0xf0] }
 0x122   : > { %v3138_v62 = vor.u32 %v3302_v39, %v3135_v56 }
 0x123   : > { %2004 = vmatpush.bf16.msrb.mxu2 %v3010_v55 }
 0x124   : > { %2053 = vmatpush.bf16.msrb.mxu3 %v3138_v62  ;;  %v3266_v62 = vld [vmem:[%s3667_s7 + $0x2cc] sm:$0xf] }
 0x126   : > { %v1452_v17 = vpop.f32.mrf.mxu2 }
 0x127   : > { %v1453_v28 = vadd.f32 %v1452_v17, %v1404_v1  ;;  %v1501_v31 = vpop.f32.mrf.mxu3  ;;  %v1357_v32 = vpop.f32.mrf.mxu0  ;;  %v2751_v17 = vld [vmem:[%s3667_s7 + $0xf8] sm:$0xf0] }
 0x128   : > { %v1406_v33 = vpop.f32.mrf.mxu1 }
 0x129   : > { %v4007_v34 = vadd.f32 %v1501_v31, %v1453_v28  ;;  %v1407_v36 = vadd.f32 %v1406_v33, %v1357_v32  ;;  %v3238_v28 = vld [vmem:[%s3667_s7 + $0x1ec] sm:$0xf]  ;;  %v2754_v32 = vor.u32 %v3206_v16, %v2751_v17  ;;  %v2879_v33 = vld [vmem:[%s3667_s7 + $0x1f8] sm:$0xf0] }
 0x12a   : > { %1552 = vmatmul.bf16.gmra.mxu0 %v3873_v44  ;;  %1601 = vmatmul.bf16.gmra.mxu1 %v3875_v45  ;;  %v2882_v39 = vor.u32 %v3238_v28, %v2879_v33 }
 0x12b   : > { %1650 = vmatmul.bf16.gmra.mxu2 %v3877_v46  ;;  %1906 = vmatpush.bf16.msrb.mxu0 %v2754_v32 }
 0x12c   : > { %1699 = vmatmul.bf16.gmra.mxu3 %v3879_v47  ;;  %1955 = vmatpush.bf16.msrb.mxu1 %v2882_v39  ;;  %v3234_v39 = vld [vmem:[%s3667_s7 + $0x1cc] sm:$0xf] }
 0x12e   : > { %v1455_v61 = vpop.f32.mrf.mxu2 }
 0x12f   : > { %v1456_v1 = vadd.f32 %v1455_v61, %v1407_v36  ;;  %v1504_v2 = vpop.f32.mrf.mxu3  ;;  %v1359_v3 = vpop.f32.mrf.mxu0 }
 0x130   : > { %v1408_v4 = vpop.f32.mrf.mxu1 }
 0x131   : > { %v4017_v5 = vadd.f32 %v1504_v2, %v1456_v1  ;;  %v1409_v7 = vadd.f32 %v1408_v4, %v1359_v3  ;;  %v2991_v1 = vld [vmem:[%s3667_s7 + $0x2d8] sm:$0xf0]  ;;  %v3298_v2 = vld [vmem:[%s3667_s7 + $0x3cc] sm:$0xf] }
 0x132   : > { %v2994_v4 = vor.u32 %v3266_v62, %v2991_v1  ;;  %v2863_v62 = vld [vmem:[%s3667_s7 + $0x1d8] sm:$0xf0] }
 0x134   : > { %2005 = vmatpush.bf16.msrb.mxu2 %v2994_v4 }
 0x136   : > { %v1457_v31 = vpop.f32.mrf.mxu2 }
 0x137   : > { %v1458_v37 = vadd.f32 %v1457_v31, %v1409_v7  ;;  %v1506_v38 = vpop.f32.mrf.mxu3  ;;  %v1362_v36 = vpop.f32.mrf.mxu0  ;;  %v3119_v7 = vld [vmem:[%s3667_s7 + $0x3d8] sm:$0xf0] }
 0x138   : > { %v1411_v55 = vpop.f32.mrf.mxu1  ;;  %v3122_v31 = vor.u32 %v3298_v2, %v3119_v7  ;;  %v2866_v2 = vor.u32 %v3234_v39, %v2863_v62 }
 0x139   : > { %v4023_v56 = vadd.f32 %v1506_v38, %v1458_v37  ;;  %v1412_v61 = vadd.f32 %v1411_v55, %v1362_v36  ;;  %v3202_v38 = vld [vmem:[%s3667_s7 + $0xcc] sm:$0xf]  ;;  %v2735_v36 = vld [vmem:[%s3667_s7 + $0xd8] sm:$0xf0] }
 0x13a   : > { %1557 = vmatmul.bf16.gmra.mxu0 %v3893_v20  ;;  %1606 = vmatmul.bf16.gmra.mxu1 %v3895_v21 }
 0x13b   : > { %1655 = vmatmul.bf16.gmra.mxu2 %v3897_v22  ;;  %2054 = vmatpush.bf16.msrb.mxu3 %v3122_v31  ;;  %v3294_v31 = vld [vmem:[%s3667_s7 + $0x3ac] sm:$0xf] }
 0x13c   : > { %1704 = vmatmul.bf16.gmra.mxu3 %v3899_v23  ;;  %v2738_v23 = vor.u32 %v3202_v38, %v2735_v36  ;;  %1956 = vmatpush.bf16.msrb.mxu1 %v2866_v2  ;;  %v3198_v2 = vld [vmem:[%s3667_s7 + $0xac] sm:$0xf] }
 0x13e   : > { %v1460_v3 = vpop.f32.mrf.mxu2  ;;  %1907 = vmatpush.bf16.msrb.mxu0 %v2738_v23  ;;  %v3103_v23 = vld [vmem:[%s3667_s7 + $0x3b8] sm:$0xf0] }
 0x13f   : > { %v1461_v16 = vadd.f32 %v1460_v3, %v1412_v61  ;;  %v1509_v17 = vpop.f32.mrf.mxu3  ;;  %v1364_v28 = vpop.f32.mrf.mxu0 }
 0x140   : > { %v1413_v32 = vpop.f32.mrf.mxu1 }
 0x141   : > { %v4033_v33 = vadd.f32 %v1509_v17, %v1461_v16  ;;  %v1414_v37 = vadd.f32 %v1413_v32, %v1364_v28  ;;  %v3262_v17 = vld [vmem:[%s3667_s7 + $0x2ac] sm:$0xf]  ;;  %v2975_v28 = vld [vmem:[%s3667_s7 + $0x2b8] sm:$0xf0] }
 0x146   : > { %v1462_v55 = vpop.f32.mrf.mxu2 }
 0x147   : > { %v1463_v1 = vadd.f32 %v1462_v55, %v1414_v37  ;;  %v1511_v61 = vpop.f32.mrf.mxu3  ;;  %v1523_v3 = vpop.f32.mrf.mxu0  ;;  %v2978_v37 = vor.u32 %v3262_v17, %v2975_v28  ;;  %v3106_v55 = vor.u32 %v3294_v31, %v3103_v23  ;;  %v3230_v17 = vld [vmem:[%s3667_s7 + $0x1ac] sm:$0xf] }
 0x148   : > { %v1572_v7 = vpop.f32.mrf.mxu1 }
 0x149   : > { %v4039_v4 = vadd.f32 %v1511_v61, %v1463_v1  ;;  %v1573_v16 = vadd.f32 %v1572_v7, %v1523_v3  ;;  %2006 = vmatpush.bf16.msrb.mxu2 %v2978_v37  ;;  %2055 = vmatpush.bf16.msrb.mxu3 %v3106_v55  ;;  %v2719_v7 = vld [vmem:[%s3667_s7 + $0xb8] sm:$0xf0] }
 0x14a   : > { %1718 = vmatmul.bf16.vlgmr.msra.gmra.mxu0 %v3744_v48  ;;  %1767 = vmatmul.bf16.vlgmr.msra.gmra.mxu1 %v3749_v53  ;;  %v2722_v28 = vor.u32 %v3198_v2, %v2719_v7  ;;  %v3290_v2 = vld [vmem:[%s3667_s7 + $0x38c] sm:$0xf]  ;;  %v3087_v7 = vld [vmem:[%s3667_s7 + $0x398] sm:$0xf0] }
 0x14b   : > { %1816 = vmatmul.bf16.vlgmr.msra.gmra.mxu2 %v3751_v54 }
 0x14c   : > { %1865 = vmatmul.bf16.vlgmr.msra.gmra.mxu3 %v3755_v57  ;;  %1908 = vmatpush.bf16.msrb.mxu0 %v2722_v28  ;;  %v3090_v28 = vor.u32 %v3290_v2, %v3087_v7 }
 0x14e   : > { %v1621_v32 = vpop.f32.mrf.mxu2  ;;  %2056 = vmatpush.bf16.msrb.mxu3 %v3090_v28  ;;  %v2943_v28 = vld [vmem:[%s3667_s7 + $0x278] sm:$0xf0] }
 0x14f   : > { %v1622_v38 = vadd.f32 %v1621_v32, %v1573_v16  ;;  %v1670_v36 = vpop.f32.mrf.mxu3  ;;  %v1525_v39 = vpop.f32.mrf.mxu0  ;;  %v2847_v32 = vld [vmem:[%s3667_s7 + $0x1b8] sm:$0xf0] }
 0x150   : > { %v1574_v62 = vpop.f32.mrf.mxu1 }
 0x151   : > { %v1671_v1 = vadd.f32 %v1670_v36, %v1622_v38  ;;  %v1575_v3 = vadd.f32 %v1574_v62, %v1525_v39  ;;  %v2850_v38 = vor.u32 %v3230_v17, %v2847_v32  ;;  %v3258_v62 = vld [vmem:[%s3667_s7 + $0x28c] sm:$0xf] }
 0x153   : > { %v2297_v61 = vpack.c.bf16 %v1671_v1, %v3921_v6  ;;  %1957 = vmatpush.bf16.msrb.mxu1 %v2850_v38  ;;  %v2959_v1 = vld [vmem:[%s3667_s7 + $0x298] sm:$0xf0]  ;;  %v3194_v38 = vld [vmem:[%s3667_s7 + $0x8c] sm:$0xf] }
 0x155   : > { %2329 = vst [vmem:[%s4051_s19] sm:$0xff] %v2297_v61 }
 0x156   : > { %v1623_v16 = vpop.f32.mrf.mxu2 }
 0x157   : > { %v1624_v31 = vadd.f32 %v1623_v16, %v1575_v3  ;;  %v1672_v37 = vpop.f32.mrf.mxu3  ;;  %v1528_v23 = vpop.f32.mrf.mxu0  ;;  %v2962_v3 = vor.u32 %v3258_v62, %v2959_v1  ;;  %v3226_v62 = vld [vmem:[%s3667_s7 + $0x18c] sm:$0xf]  ;;  %v2831_v1 = vld [vmem:[%s3667_s7 + $0x198] sm:$0xf0] }
 0x158   : > { %v1577_v6 = vpop.f32.mrf.mxu1  ;;  %v2834_v7 = vor.u32 %v3226_v62, %v2831_v1 }
 0x159   : > { %v1673_v36 = vadd.f32 %v1672_v37, %v1624_v31  ;;  %v1578_v55 = vadd.f32 %v1577_v6, %v1528_v23  ;;  %2007 = vmatpush.bf16.msrb.mxu2 %v2962_v3  ;;  %v2703_v6 = vld [vmem:[%s3667_s7 + $0x98] sm:$0xf0] }
 0x15a   : > { %1723 = vmatmul.bf16.gmra.mxu0 %v3773_v24  ;;  %1772 = vmatmul.bf16.gmra.mxu1 %v3775_v25 }
 0x15b   : > { %v2299_v39 = vpack.c.bf16 %v1673_v36, %v3927_v35  ;;  %1821 = vmatmul.bf16.gmra.mxu2 %v3777_v26  ;;  %1958 = vmatpush.bf16.msrb.mxu1 %v2834_v7 }
 0x15c   : > { %1870 = vmatmul.bf16.gmra.mxu3 %v3779_v27 }
 0x15d   : > { %2331 = vst [vmem:[%s4051_s19 + $0x10] sm:$0xff] %v2299_v39  ;;  %v2706_v39 = vor.u32 %v3194_v38, %v2703_v6 }
 0x15e   : > { %v1626_v61 = vpop.f32.mrf.mxu2 }
 0x15f   : > { %v1627_v17 = vadd.f32 %v1626_v61, %v1578_v55  ;;  %v1675_v35 = vpop.f32.mrf.mxu3  ;;  %v1530_v16 = vpop.f32.mrf.mxu0  ;;  %1909 = vmatpush.bf16.msrb.mxu0 %v2706_v39 }
 0x160   : > { %v1579_v32 = vpop.f32.mrf.mxu1 }
 0x161   : > { %v1676_v31 = vadd.f32 %v1675_v35, %v1627_v17  ;;  %v1580_v23 = vadd.f32 %v1579_v32, %v1530_v16  ;;  %v3254_v16 = vld [vmem:[%s3667_s7 + $0x26c] sm:$0xf] }
 0x163   : > { %v2301_v37 = vpack.c.bf16 %v1676_v31, %v3937_v0  ;;  %v2946_v31 = vor.u32 %v3254_v16, %v2943_v28 }
 0x165   : > { %2333 = vst [vmem:[%s4051_s19 + $0x20] sm:$0xff] %v2301_v37  ;;  %v3286_v37 = vld [vmem:[%s3667_s7 + $0x36c] sm:$0xf]  ;;  %2008 = vmatpush.bf16.msrb.mxu2 %v2946_v31 }
 0x166   : > { %v1628_v36 = vpop.f32.mrf.mxu2 }
 0x167   : > { %v1629_v55 = vadd.f32 %v1628_v36, %v1580_v23  ;;  %v1677_v61 = vpop.f32.mrf.mxu3  ;;  %v1533_v2 = vpop.f32.mrf.mxu0  ;;  %v3071_v23 = vld [vmem:[%s3667_s7 + $0x378] sm:$0xf0] }
 0x168   : > { %v1582_v3 = vpop.f32.mrf.mxu1  ;;  %v3074_v36 = vor.u32 %v3286_v37, %v3071_v23 }
 0x169   : > { %v1678_v0 = vadd.f32 %v1677_v61, %v1629_v55  ;;  %v1583_v35 = vadd.f32 %v1582_v3, %v1533_v2  ;;  %v3190_v61 = vld [vmem:[%s3667_s7 + $0x6c] sm:$0xf]  ;;  %v2687_v2 = vld [vmem:[%s3667_s7 + $0x78] sm:$0xf0] }
 0x16a   : > { %1728 = vmatmul.bf16.gmra.mxu0 %v3793_v49  ;;  %1777 = vmatmul.bf16.gmra.mxu1 %v3795_v50  ;;  %v2690_v3 = vor.u32 %v3190_v61, %v2687_v2 }
 0x16b   : > { %v2303_v17 = vpack.c.bf16 %v1678_v0, %v3943_v30  ;;  %1826 = vmatmul.bf16.gmra.mxu2 %v3797_v51  ;;  %2057 = vmatpush.bf16.msrb.mxu3 %v3074_v36  ;;  %v3222_v0 = vld [vmem:[%s3667_s7 + $0x16c] sm:$0xf] }
 0x16c   : > { %1875 = vmatmul.bf16.gmra.mxu3 %v3799_v52  ;;  %1910 = vmatpush.bf16.msrb.mxu0 %v2690_v3 }
 0x16d   : > { %2335 = vst [vmem:[%s4051_s19 + $0x30] sm:$0xff] %v2303_v17  ;;  %v2815_v17 = vld [vmem:[%s3667_s7 + $0x178] sm:$0xf0] }
 0x16e   : > { %v1631_v32 = vpop.f32.mrf.mxu2 }
 0x16f   : > { %v1632_v38 = vadd.f32 %v1631_v32, %v1583_v35  ;;  %v1680_v30 = vpop.f32.mrf.mxu3  ;;  %v1535_v6 = vpop.f32.mrf.mxu0  ;;  %v2818_v32 = vor.u32 %v3222_v0, %v2815_v17  ;;  %v3186_v17 = vld [vmem:[%s3667_s7 + $0x4c] sm:$0xf] }
 0x170   : > { %v1584_v39 = vpop.f32.mrf.mxu1 }
 0x171   : > { %v1681_v62 = vadd.f32 %v1680_v30, %v1632_v38  ;;  %v1585_v55 = vadd.f32 %v1584_v39, %v1535_v6  ;;  %1959 = vmatpush.bf16.msrb.mxu1 %v2818_v32  ;;  %v3250_v38 = vld [vmem:[%s3667_s7 + $0x24c] sm:$0xf]  ;;  %v2927_v30 = vld [vmem:[%s3667_s7 + $0x258] sm:$0xf0] }
 0x172   : > { %v2930_v36 = vor.u32 %v3250_v38, %v2927_v30  ;;  %v3282_v39 = vld [vmem:[%s3667_s7 + $0x34c] sm:$0xf] }
 0x173   : > { %v2305_v1 = vpack.c.bf16 %v1681_v62, %v3953_v60  ;;  %v3055_v62 = vld [vmem:[%s3667_s7 + $0x358] sm:$0xf0]  ;;  %v3218_v32 = vld [vmem:[%s3667_s7 + $0x14c] sm:$0xf] }
 0x174   : > { %v3058_v61 = vor.u32 %v3282_v39, %v3055_v62  ;;  %2009 = vmatpush.bf16.msrb.mxu2 %v2930_v36  ;;  %v3246_v39 = vld [vmem:[%s3667_s7 + $0x22c] sm:$0xf]  ;;  %v2911_v62 = vld [vmem:[%s3667_s7 + $0x238] sm:$0xf0] }
 0x175   : > { %2337 = vst [vmem:[%s4051_s19 + $0x40] sm:$0xff] %v2305_v1 }
 0x176   : > { %v1633_v7 = vpop.f32.mrf.mxu2  ;;  %2058 = vmatpush.bf16.msrb.mxu3 %v3058_v61  ;;  %v3039_v61 = vld [vmem:[%s3667_s7 + $0x338] sm:$0xf0] }
 0x177   : > { %v1634_v35 = vadd.f32 %v1633_v7, %v1585_v55  ;;  %v1682_v16 = vpop.f32.mrf.mxu3  ;;  %v1538_v28 = vpop.f32.mrf.mxu0 }
 0x178   : > { %v1587_v31 = vpop.f32.mrf.mxu1 }
 0x179   : > { %v1683_v60 = vadd.f32 %v1682_v16, %v1634_v35  ;;  %v1588_v23 = vadd.f32 %v1587_v31, %v1538_v28  ;;  %v2671_v35 = vld [vmem:[%s3667_s7 + $0x58] sm:$0xf0] }
 0x17a   : > { %1733 = vmatmul.bf16.gmra.mxu0 %v3813_v12  ;;  %1782 = vmatmul.bf16.gmra.mxu1 %v3815_v13  ;;  %v2674_v28 = vor.u32 %v3186_v17, %v2671_v35  ;;  %v2799_v31 = vld [vmem:[%s3667_s7 + $0x158] sm:$0xf0] }
 0x17b   : > { %v2307_v37 = vpack.c.bf16 %v1683_v60, %v3959_v19  ;;  %1831 = vmatmul.bf16.gmra.mxu2 %v3817_v14  ;;  %v2802_v38 = vor.u32 %v3218_v32, %v2799_v31  ;;  %v2655_v32 = vld [vmem:[%s3667_s7 + $0x38] sm:$0xf0] }
 0x17c   : > { %1880 = vmatmul.bf16.gmra.mxu3 %v3819_v15  ;;  %1911 = vmatpush.bf16.msrb.mxu0 %v2674_v28  ;;  %v3182_v28 = vld [vmem:[%s3667_s7 + $0x2c] sm:$0xf] }
 0x17d   : > { %2339 = vst [vmem:[%s4051_s19 + $0x50] sm:$0xff] %v2307_v37  ;;  %1960 = vmatpush.bf16.msrb.mxu1 %v2802_v38 }
 0x17e   : > { %v1636_v6 = vpop.f32.mrf.mxu2 }
 0x17f   : > { %v1637_v1 = vadd.f32 %v1636_v6, %v1588_v23  ;;  %v1685_v19 = vpop.f32.mrf.mxu3  ;;  %v1540_v55 = vpop.f32.mrf.mxu0 }
 0x180   : > { %v1589_v2 = vpop.f32.mrf.mxu1 }
 0x181   : > { %v1686_v7 = vadd.f32 %v1685_v19, %v1637_v1  ;;  %v1590_v0 = vadd.f32 %v1589_v2, %v1540_v55  ;;  %v2914_v19 = vor.u32 %v3246_v39, %v2911_v62  ;;  %v3278_v55 = vld [vmem:[%s3667_s7 + $0x32c] sm:$0xf] }
 0x183   : > { %v2309_v3 = vpack.c.bf16 %v1686_v7, %v3969_v58  ;;  %2010 = vmatpush.bf16.msrb.mxu2 %v2914_v19  ;;  %v2895_v19 = vld [vmem:[%s3667_s7 + $0x218] sm:$0xf0] }
 0x185   : > { %2341 = vst [vmem:[%s4051_s19 + $0x60] sm:$0xff] %v2309_v3  ;;  %v3042_v3 = vor.u32 %v3278_v55, %v3039_v61 }
 0x186   : > { %v1638_v16 = vpop.f32.mrf.mxu2 }
 0x187   : > { %v1639_v60 = vadd.f32 %v1638_v16, %v1590_v0  ;;  %v1687_v37 = vpop.f32.mrf.mxu3  ;;  %v1543_v23 = vpop.f32.mrf.mxu0  ;;  %2059 = vmatpush.bf16.msrb.mxu3 %v3042_v3 }
 0x188   : > { %v1592_v30 = vpop.f32.mrf.mxu1 }
 0x189   : > { %v1688_v58 = vadd.f32 %v1687_v37, %v1639_v60  ;;  %v1593_v36 = vadd.f32 %v1592_v30, %v1543_v23  ;;  %v2658_v60 = vor.u32 %v3182_v28, %v2655_v32  ;;  %v3214_v37 = vld [vmem:[%s3667_s7 + $0x12c] sm:$0xf]  ;;  %v2783_v23 = vld [vmem:[%s3667_s7 + $0x138] sm:$0xf0] }
 0x18a   : > { %1738 = vmatmul.bf16.gmra.mxu0 %v3833_v40  ;;  %1787 = vmatmul.bf16.gmra.mxu1 %v3835_v41  ;;  %v3178_v32 = vld [vmem:[%s3667_s7 + $0xc] sm:$0xf] }
 0x18b   : > { %v2311_v6 = vpack.c.bf16 %v1688_v58, %v3975_v18  ;;  %1836 = vmatmul.bf16.gmra.mxu2 %v3837_v42  ;;  %1912 = vmatpush.bf16.msrb.mxu0 %v2658_v60 }
 0x18c   : > { %1885 = vmatmul.bf16.gmra.mxu3 %v3839_v43 }
 0x18d   : > { %2343 = vst [vmem:[%s4051_s19 + $0x70] sm:$0xff] %v2311_v6  ;;  %v2786_v6 = vor.u32 %v3214_v37, %v2783_v23  ;;  %v3210_v23 = vld [vmem:[%s3667_s7 + $0x10c] sm:$0xf] }
 0x18e   : > { %v1641_v1 = vpop.f32.mrf.mxu2 }
 0x18f   : > { %v1642_v2 = vadd.f32 %v1641_v1, %v1593_v36  ;;  %v1690_v18 = vpop.f32.mrf.mxu3  ;;  %v1545_v7 = vpop.f32.mrf.mxu0  ;;  %1961 = vmatpush.bf16.msrb.mxu1 %v2786_v6  ;;  %v3242_v1 = vld [vmem:[%s3667_s7 + $0x20c] sm:$0xf] }
 0x190   : > { %v1594_v0 = vpop.f32.mrf.mxu1  ;;  %v2898_v61 = vor.u32 %v3242_v1, %v2895_v19 }
 0x191   : > { %v1691_v17 = vadd.f32 %v1690_v18, %v1642_v2  ;;  %v1595_v16 = vadd.f32 %v1594_v0, %v1545_v7  ;;  %v3274_v2 = vld [vmem:[%s3667_s7 + $0x30c] sm:$0xf]  ;;  %v3023_v18 = vld [vmem:[%s3667_s7 + $0x318] sm:$0xf0] }
 0x192   : > { %v3026_v0 = vor.u32 %v3274_v2, %v3023_v18  ;;  %2011 = vmatpush.bf16.msrb.mxu2 %v2898_v61 }
 0x193   : > { %v2313_v35 = vpack.c.bf16 %v1691_v17, %v3985_v59 }
 0x194   : > { %2060 = vmatpush.bf16.msrb.mxu3 %v3026_v0 }
 0x195   : > { %2345 = vst [vmem:[%s4051_s19 + $0x80] sm:$0xff] %v2313_v35 }
 0x196   : > { %v1643_v31 = vpop.f32.mrf.mxu2 }
 0x197   : > { %v1644_v38 = vadd.f32 %v1643_v31, %v1595_v16  ;;  %v1692_v30 = vpop.f32.mrf.mxu3  ;;  %v1548_v58 = vpop.f32.mrf.mxu0  ;;  %v2639_v31 = vld [vmem:[%s3667_s7 + $0x18] sm:$0xf0] }
 0x198   : > { %v1597_v36 = vpop.f32.mrf.mxu1  ;;  %v2642_v37 = vor.u32 %v3178_v32, %v2639_v31  ;;  %v4306_v31 = vld [vmem:[#allocation12_spill] sm:$0xff] }
 0x199   : > { %v1693_v59 = vadd.f32 %v1692_v30, %v1644_v38  ;;  %v1598_v62 = vadd.f32 %v1597_v36, %v1548_v58  ;;  %v2767_v38 = vld [vmem:[%s3667_s7 + $0x118] sm:$0xf0] }
 0x19a   : > { %1743 = vmatmul.bf16.gmra.mxu0 %v3853_v8  ;;  %1792 = vmatmul.bf16.gmra.mxu1 %v3855_v9  ;;  %v2770_v36 = vor.u32 %v3210_v23, %v2767_v38 }
 0x19b   : > { %v2315_v39 = vpack.c.bf16 %v1693_v59, %v3991_v29  ;;  %1841 = vmatmul.bf16.gmra.mxu2 %v3857_v10  ;;  %1913 = vmatpush.bf16.msrb.mxu0 %v2642_v37 }
 0x19c   : > { %1890 = vmatmul.bf16.gmra.mxu3 %v3859_v11  ;;  %1962 = vmatpush.bf16.msrb.mxu1 %v2770_v36 }
 0x19d   : > { %2347 = vst [vmem:[%s4051_s19 + $0x90] sm:$0xff] %v2315_v39 }
 0x19e   : > { %v1646_v55 = vpop.f32.mrf.mxu2 }
 0x19f   : > { %v1647_v7 = vadd.f32 %v1646_v55, %v1598_v62  ;;  %v1695_v29 = vpop.f32.mrf.mxu3  ;;  %v1550_v3 = vpop.f32.mrf.mxu0 }
 0x1a0   : > { %v1599_v17 = vpop.f32.mrf.mxu1 }
 0x1a1   : > { %v1696_v35 = vadd.f32 %v1695_v29, %v1647_v7  ;;  %v1600_v28 = vadd.f32 %v1599_v17, %v1550_v3 }
 0x1a3   : > { %v2317_v16 = vpack.c.bf16 %v1696_v35, %v4001_v63 }
 0x1a5   : > { %2349 = vst [vmem:[%s4051_s19 + $0xa0] sm:$0xff] %v2317_v16 }
 0x1a6   : > { %v1648_v60 = vpop.f32.mrf.mxu2 }
 0x1a7   : > { %v1649_v30 = vadd.f32 %v1648_v60, %v1600_v28  ;;  %v1697_v58 = vpop.f32.mrf.mxu3  ;;  %v1553_v6 = vpop.f32.mrf.mxu0 }
 0x1a8   : > { %v1602_v59 = vpop.f32.mrf.mxu1 }
 0x1a9   : > { %v1698_v39 = vadd.f32 %v1697_v58, %v1649_v30  ;;  %v1603_v62 = vadd.f32 %v1602_v59, %v1553_v6 }
 0x1aa   : > { %1748 = vmatmul.bf16.gmra.mxu0 %v3873_v44  ;;  %1797 = vmatmul.bf16.gmra.mxu1 %v3875_v45 }
 0x1ab   : > { %v2319_v63 = vpack.c.bf16 %v1698_v39, %v4007_v34  ;;  %1846 = vmatmul.bf16.gmra.mxu2 %v3877_v46 }
 0x1ac   : > { %1895 = vmatmul.bf16.gmra.mxu3 %v3879_v47 }
 0x1ad   : > { %2351 = vst [vmem:[%s4051_s19 + $0xb0] sm:$0xff] %v2319_v63 }
 0x1ae   : > { %v1651_v1 = vpop.f32.mrf.mxu2 }
 0x1af   : > { %v1652_v19 = vadd.f32 %v1651_v1, %v1603_v62  ;;  %v1700_v55 = vpop.f32.mrf.mxu3  ;;  %v1555_v61 = vpop.f32.mrf.mxu0 }
 0x1b0   : > { %v1604_v2 = vpop.f32.mrf.mxu1 }
 0x1b1   : > { %v1701_v18 = vadd.f32 %v1700_v55, %v1652_v19  ;;  %v1605_v29 = vadd.f32 %v1604_v2, %v1555_v61 }
 0x1b3   : > { %v2321_v7 = vpack.c.bf16 %v1701_v18, %v4017_v5 }
 0x1b5   : > { %2353 = vst [vmem:[%s4051_s19 + $0xc0] sm:$0xff] %v2321_v7 }
 0x1b6   : > { %v1653_v34 = vpop.f32.mrf.mxu2 }
 0x1b7   : > { %v1654_v3 = vadd.f32 %v1653_v34, %v1605_v29  ;;  %v1702_v0 = vpop.f32.mrf.mxu3  ;;  %v1558_v17 = vpop.f32.mrf.mxu0 }
 0x1b8   : > { %v1607_v35 = vpop.f32.mrf.mxu1 }
 0x1b9   : > { %v1703_v16 = vadd.f32 %v1702_v0, %v1654_v3  ;;  %v1608_v32 = vadd.f32 %v1607_v35, %v1558_v17 }
 0x1ba   : > { %1753 = vmatmul.bf16.gmra.mxu0 %v3893_v20  ;;  %1802 = vmatmul.bf16.gmra.mxu1 %v3895_v21 }
 0x1bb   : > { %v2323_v28 = vpack.c.bf16 %v1703_v16, %v4023_v56  ;;  %1851 = vmatmul.bf16.gmra.mxu2 %v3897_v22 }
 0x1bc   : > { %1900 = vmatmul.bf16.gmra.mxu3 %v4306_v31 }
 0x1bd   : > { %2355 = vst [vmem:[%s4051_s19 + $0xd0] sm:$0xff] %v2323_v28 }
 0x1be   : > { %v1656_v5 = vpop.f32.mrf.mxu2 }
 0x1bf   : > { %v1657_v60 = vadd.f32 %v1656_v5, %v1608_v32  ;;  %v1705_v37 = vpop.f32.mrf.mxu3  ;;  %v1560_v23 = vpop.f32.mrf.mxu0 }
 0x1c0   : > { %v1609_v38 = vpop.f32.mrf.mxu1 }
 0x1c1   : > { %v1706_v30 = vadd.f32 %v1705_v37, %v1657_v60  ;;  %v1610_v6 = vadd.f32 %v1609_v38, %v1560_v23 }
 0x1c3   : > { %v2325_v58 = vpack.c.bf16 %v1706_v30, %v4033_v33 }
 0x1c5   : > { %2357 = vst [vmem:[%s4051_s19 + $0xe0] sm:$0xff] %v2325_v58 }
 0x1c6   : > { %v1658_v56 = vpop.f32.mrf.mxu2 }
 0x1c7   : > { %v1659_v36 = vadd.f32 %v1658_v56, %v1610_v6  ;;  %v1707_v59 = vpop.f32.mrf.mxu3  ;;  %v1719_v39 = vpop.f32.mrf.mxu0 }
 0x1c8   : > { %v1768_v63 = vpop.f32.mrf.mxu1 }
 0x1c9   : > { %v1708_v62 = vadd.f32 %v1707_v59, %v1659_v36  ;;  %v1769_v1 = vadd.f32 %v1768_v63, %v1719_v39 }
 0x1ca   : > { %1914 = vmatmul.bf16.vlgmr.msrb.gmra.mxu0 %v3744_v48  ;;  %1963 = vmatmul.bf16.vlgmr.msrb.gmra.mxu1 %v3749_v53 }
 0x1cb   : > { %v2327_v19 = vpack.c.bf16 %v1708_v62, %v4039_v4  ;;  %2012 = vmatmul.bf16.vlgmr.msrb.gmra.mxu2 %v3751_v54 }
 0x1cc   : > { %2061 = vmatmul.bf16.vlgmr.msrb.gmra.mxu3 %v3755_v57 }
 0x1cd   : > { %2359 = vst [vmem:[%s4051_s19 + $0xf0] sm:$0xff] %v2327_v19 }
 0x1ce   : > { %v1817_v33 = vpop.f32.mrf.mxu2 }
 0x1cf   : > { %v1818_v55 = vadd.f32 %v1817_v33, %v1769_v1  ;;  %v1866_v61 = vpop.f32.mrf.mxu3  ;;  %v1721_v2 = vpop.f32.mrf.mxu0 }
 0x1d0   : > { %v1770_v18 = vpop.f32.mrf.mxu1 }
 0x1d1   : > { %v4160_v7 = vadd.f32 %v1866_v61, %v1818_v55  ;;  %v1771_v29 = vadd.f32 %v1770_v18, %v1721_v2 }
 0x1d6   : > { %v1819_v34 = vpop.f32.mrf.mxu2 }
 0x1d7   : > { %v1820_v3 = vadd.f32 %v1819_v34, %v1771_v29  ;;  %v1868_v48 = vpop.f32.mrf.mxu3  ;;  %v1724_v0 = vpop.f32.mrf.mxu0 }
 0x1d8   : > { %v1773_v4 = vpop.f32.mrf.mxu1 }
 0x1d9   : > { %v4162_v17 = vadd.f32 %v1868_v48, %v1820_v3  ;;  %v1774_v53 = vadd.f32 %v1773_v4, %v1724_v0 }
 0x1da   : > { %1919 = vmatmul.bf16.gmra.mxu0 %v3773_v24  ;;  %1968 = vmatmul.bf16.gmra.mxu1 %v3775_v25 }
 0x1db   : > { %2017 = vmatmul.bf16.gmra.mxu2 %v3777_v26 }
 0x1dc   : > { %2066 = vmatmul.bf16.gmra.mxu3 %v3779_v27 }
 0x1de   : > { %v1822_v54 = vpop.f32.mrf.mxu2 }
 0x1df   : > { %v1823_v57 = vadd.f32 %v1822_v54, %v1774_v53  ;;  %v1871_v35 = vpop.f32.mrf.mxu3  ;;  %v1726_v16 = vpop.f32.mrf.mxu0 }
 0x1e0   : > { %v1775_v28 = vpop.f32.mrf.mxu1 }
 0x1e1   : > { %v4168_v32 = vadd.f32 %v1871_v35, %v1823_v57  ;;  %v1776_v5 = vadd.f32 %v1775_v28, %v1726_v16 }
 0x1e6   : > { %v1824_v60 = vpop.f32.mrf.mxu2 }
 0x1e7   : > { %v1825_v37 = vadd.f32 %v1824_v60, %v1776_v5  ;;  %v1873_v23 = vpop.f32.mrf.mxu3  ;;  %v1729_v38 = vpop.f32.mrf.mxu0 }
 0x1e8   : > { %v1778_v30 = vpop.f32.mrf.mxu1 }
 0x1e9   : > { %v4170_v24 = vadd.f32 %v1873_v23, %v1825_v37  ;;  %v1779_v25 = vadd.f32 %v1778_v30, %v1729_v38 }
 0x1ea   : > { %1924 = vmatmul.bf16.gmra.mxu0 %v3793_v49  ;;  %1973 = vmatmul.bf16.gmra.mxu1 %v3795_v50 }
 0x1eb   : > { %2022 = vmatmul.bf16.gmra.mxu2 %v3797_v51 }
 0x1ec   : > { %2071 = vmatmul.bf16.gmra.mxu3 %v3799_v52 }
 0x1ee   : > { %v1827_v26 = vpop.f32.mrf.mxu2 }
 0x1ef   : > { %v1828_v27 = vadd.f32 %v1827_v26, %v1779_v25  ;;  %v1876_v58 = vpop.f32.mrf.mxu3  ;;  %v1731_v6 = vpop.f32.mrf.mxu0 }
 0x1f0   : > { %v1780_v56 = vpop.f32.mrf.mxu1 }
 0x1f1   : > { %v4176_v36 = vadd.f32 %v1876_v58, %v1828_v27  ;;  %v1781_v59 = vadd.f32 %v1780_v56, %v1731_v6 }
 0x1f6   : > { %v1829_v39 = vpop.f32.mrf.mxu2 }
 0x1f7   : > { %v1830_v63 = vadd.f32 %v1829_v39, %v1781_v59  ;;  %v1878_v62 = vpop.f32.mrf.mxu3  ;;  %v1734_v1 = vpop.f32.mrf.mxu0 }
 0x1f8   : > { %v1783_v19 = vpop.f32.mrf.mxu1 }
 0x1f9   : > { %v4178_v49 = vadd.f32 %v1878_v62, %v1830_v63  ;;  %v1784_v50 = vadd.f32 %v1783_v19, %v1734_v1 }
 0x1fa   : > { %1929 = vmatmul.bf16.gmra.mxu0 %v3813_v12  ;;  %1978 = vmatmul.bf16.gmra.mxu1 %v3815_v13 }
 0x1fb   : > { %2027 = vmatmul.bf16.gmra.mxu2 %v3817_v14 }
 0x1fc   : > { %2076 = vmatmul.bf16.gmra.mxu3 %v3819_v15 }
 0x1fe   : > { %v1832_v51 = vpop.f32.mrf.mxu2 }
 0x1ff   : > { %v1833_v52 = vadd.f32 %v1832_v51, %v1784_v50  ;;  %v1881_v33 = vpop.f32.mrf.mxu3  ;;  %v1736_v55 = vpop.f32.mrf.mxu0 }
 0x200   : > { %v1785_v61 = vpop.f32.mrf.mxu1 }
 0x201   : > { %v4184_v2 = vadd.f32 %v1881_v33, %v1833_v52  ;;  %v1786_v18 = vadd.f32 %v1785_v61, %v1736_v55 }
 0x206   : > { %v1834_v29 = vpop.f32.mrf.mxu2 }
 0x207   : > { %v1835_v34 = vadd.f32 %v1834_v29, %v1786_v18  ;;  %v1883_v3 = vpop.f32.mrf.mxu3  ;;  %v1739_v48 = vpop.f32.mrf.mxu0 }
 0x208   : > { %v1788_v0 = vpop.f32.mrf.mxu1 }
 0x209   : > { %v4186_v12 = vadd.f32 %v1883_v3, %v1835_v34  ;;  %v1789_v13 = vadd.f32 %v1788_v0, %v1739_v48 }
 0x20a   : > { %1934 = vmatmul.bf16.gmra.mxu0 %v3833_v40  ;;  %1983 = vmatmul.bf16.gmra.mxu1 %v3835_v41 }
 0x20b   : > { %2032 = vmatmul.bf16.gmra.mxu2 %v3837_v42 }
 0x20c   : > { %2081 = vmatmul.bf16.gmra.mxu3 %v3839_v43 }
 0x20e   : > { %v1837_v14 = vpop.f32.mrf.mxu2 }
 0x20f   : > { %v1838_v15 = vadd.f32 %v1837_v14, %v1789_v13  ;;  %v1886_v4 = vpop.f32.mrf.mxu3  ;;  %v1741_v53 = vpop.f32.mrf.mxu0 }
 0x210   : > { %v1790_v54 = vpop.f32.mrf.mxu1 }
 0x211   : > { %v4192_v57 = vadd.f32 %v1886_v4, %v1838_v15  ;;  %v1791_v35 = vadd.f32 %v1790_v54, %v1741_v53 }
 0x216   : > { %v1839_v16 = vpop.f32.mrf.mxu2 }
 0x217   : > { %v1840_v28 = vadd.f32 %v1839_v16, %v1791_v35  ;;  %v1888_v5 = vpop.f32.mrf.mxu3  ;;  %v1744_v60 = vpop.f32.mrf.mxu0 }
 0x218   : > { %v1793_v37 = vpop.f32.mrf.mxu1 }
 0x219   : > { %v4194_v40 = vadd.f32 %v1888_v5, %v1840_v28  ;;  %v1794_v41 = vadd.f32 %v1793_v37, %v1744_v60 }
 0x21a   : > { %1939 = vmatmul.bf16.gmra.mxu0 %v3853_v8  ;;  %1988 = vmatmul.bf16.gmra.mxu1 %v3855_v9 }
 0x21b   : > { %2037 = vmatmul.bf16.gmra.mxu2 %v3857_v10 }
 0x21c   : > { %2086 = vmatmul.bf16.gmra.mxu3 %v3859_v11 }
 0x21e   : > { %v1842_v42 = vpop.f32.mrf.mxu2 }
 0x21f   : > { %v1843_v43 = vadd.f32 %v1842_v42, %v1794_v41  ;;  %v1891_v23 = vpop.f32.mrf.mxu3  ;;  %v1746_v38 = vpop.f32.mrf.mxu0 }
 0x220   : > { %v1795_v30 = vpop.f32.mrf.mxu1 }
 0x221   : > { %v4200_v25 = vadd.f32 %v1891_v23, %v1843_v43  ;;  %v1796_v26 = vadd.f32 %v1795_v30, %v1746_v38 }
 0x226   : > { %v1844_v27 = vpop.f32.mrf.mxu2 }
 0x227   : > { %v1845_v58 = vadd.f32 %v1844_v27, %v1796_v26  ;;  %v1893_v6 = vpop.f32.mrf.mxu3  ;;  %v1749_v56 = vpop.f32.mrf.mxu0 }
 0x228   : > { %v1798_v59 = vpop.f32.mrf.mxu1 }
 0x229   : > { %v4202_v8 = vadd.f32 %v1893_v6, %v1845_v58  ;;  %v1799_v9 = vadd.f32 %v1798_v59, %v1749_v56 }
 0x22a   : > { %1944 = vmatmul.bf16.gmra.mxu0 %v3873_v44  ;;  %1993 = vmatmul.bf16.gmra.mxu1 %v3875_v45 }
 0x22b   : > { %2042 = vmatmul.bf16.gmra.mxu2 %v3877_v46 }
 0x22c   : > { %2091 = vmatmul.bf16.gmra.mxu3 %v3879_v47 }
 0x22e   : > { %v1847_v10 = vpop.f32.mrf.mxu2 }
 0x22f   : > { %v1848_v11 = vadd.f32 %v1847_v10, %v1799_v9  ;;  %v1896_v39 = vpop.f32.mrf.mxu3  ;;  %v1751_v63 = vpop.f32.mrf.mxu0 }
 0x230   : > { %v1800_v62 = vpop.f32.mrf.mxu1 }
 0x231   : > { %v4208_v1 = vadd.f32 %v1896_v39, %v1848_v11  ;;  %v1801_v19 = vadd.f32 %v1800_v62, %v1751_v63 }
 0x236   : > { %v1849_v50 = vpop.f32.mrf.mxu2 }
 0x237   : > { %v1850_v51 = vadd.f32 %v1849_v50, %v1801_v19  ;;  %v1898_v52 = vpop.f32.mrf.mxu3  ;;  %v1754_v33 = vpop.f32.mrf.mxu0 }
 0x238   : > { %v1803_v55 = vpop.f32.mrf.mxu1 }
 0x239   : > { %v4210_v44 = vadd.f32 %v1898_v52, %v1850_v51  ;;  %v1804_v45 = vadd.f32 %v1803_v55, %v1754_v33 }
 0x23a   : > { %1949 = vmatmul.bf16.gmra.mxu0 %v3893_v20  ;;  %1998 = vmatmul.bf16.gmra.mxu1 %v3895_v21 }
 0x23b   : > { %2047 = vmatmul.bf16.gmra.mxu2 %v3897_v22 }
 0x23c   : > { %2096 = vmatmul.bf16.gmra.mxu3 %v4306_v31 }
 0x23e   : > { %v1852_v46 = vpop.f32.mrf.mxu2 }
 0x23f   : > { %v1853_v47 = vadd.f32 %v1852_v46, %v1804_v45  ;;  %v1901_v61 = vpop.f32.mrf.mxu3  ;;  %v1756_v18 = vpop.f32.mrf.mxu0 }
 0x240   : > { %v1805_v29 = vpop.f32.mrf.mxu1 }
 0x241   : > { %v4216_v34 = vadd.f32 %v1901_v61, %v1853_v47  ;;  %v1806_v3 = vadd.f32 %v1805_v29, %v1756_v18 }
 0x246   : > { %v1854_v48 = vpop.f32.mrf.mxu2 }
 0x247   : > { %v1855_v0 = vadd.f32 %v1854_v48, %v1806_v3  ;;  %v1903_v13 = vpop.f32.mrf.mxu3  ;;  %v1915_v14 = vpop.f32.mrf.mxu0 }
 0x248   : > { %v1964_v20 = vpop.f32.mrf.mxu1 }
 0x249   : > { %v4218_v15 = vadd.f32 %v1903_v13, %v1855_v0  ;;  %v1965_v21 = vadd.f32 %v1964_v20, %v1915_v14 }
 0x24e   : > { %v2013_v22 = vpop.f32.mrf.mxu2 }
 0x24f   : > { %v2014_v4 = vadd.f32 %v2013_v22, %v1965_v21  ;;  %v2062_v31 = vpop.f32.mrf.mxu3  ;;  %v1917_v53 = vpop.f32.mrf.mxu0 }
 0x250   : > { %v1966_v54 = vpop.f32.mrf.mxu1 }
 0x251   : > { %v2063_v35 = vadd.f32 %v2062_v31, %v2014_v4  ;;  %v1967_v28 = vadd.f32 %v1966_v54, %v1917_v53 }
 0x253   : > { %v2298_v16 = vpack.c.bf16 %v2063_v35, %v4160_v7 }
 0x255   : > { %2330 = vst [vmem:[%s4051_s19 + $0x8] sm:$0xff] %v2298_v16 }
 0x256   : > { %v2015_v5 = vpop.f32.mrf.mxu2 }
 0x257   : > { %v2016_v60 = vadd.f32 %v2015_v5, %v1967_v28  ;;  %v2064_v37 = vpop.f32.mrf.mxu3  ;;  %v1920_v41 = vpop.f32.mrf.mxu0 }
 0x258   : > { %v1969_v42 = vpop.f32.mrf.mxu1 }
 0x259   : > { %v2065_v43 = vadd.f32 %v2064_v37, %v2016_v60  ;;  %v1970_v38 = vadd.f32 %v1969_v42, %v1920_v41 }
 0x25b   : > { %v2300_v23 = vpack.c.bf16 %v2065_v43, %v4162_v17 }
 0x25d   : > { %2332 = vst [vmem:[%s4051_s19 + $0x18] sm:$0xff] %v2300_v23 }
 0x25e   : > { %v2018_v30 = vpop.f32.mrf.mxu2 }
 0x25f   : > { %v2019_v26 = vadd.f32 %v2018_v30, %v1970_v38  ;;  %v2067_v27 = vpop.f32.mrf.mxu3  ;;  %v1922_v58 = vpop.f32.mrf.mxu0 }
 0x260   : > { %v1971_v6 = vpop.f32.mrf.mxu1 }
 0x261   : > { %v2068_v7 = vadd.f32 %v2067_v27, %v2019_v26  ;;  %v1972_v59 = vadd.f32 %v1971_v6, %v1922_v58 }
 0x263   : > { %v2302_v56 = vpack.c.bf16 %v2068_v7, %v4168_v32 }
 0x265   : > { %2334 = vst [vmem:[%s4051_s19 + $0x28] sm:$0xff] %v2302_v56 }
 0x266   : > { %v2020_v9 = vpop.f32.mrf.mxu2 }
 0x267   : > { %v2021_v10 = vadd.f32 %v2020_v9, %v1972_v59  ;;  %v2069_v11 = vpop.f32.mrf.mxu3  ;;  %v1925_v39 = vpop.f32.mrf.mxu0 }
 0x268   : > { %v1974_v63 = vpop.f32.mrf.mxu1 }
 0x269   : > { %v2070_v17 = vadd.f32 %v2069_v11, %v2021_v10  ;;  %v1975_v19 = vadd.f32 %v1974_v63, %v1925_v39 }
 0x26b   : > { %v2304_v62 = vpack.c.bf16 %v2070_v17, %v4170_v24 }
 0x26d   : > { %2336 = vst [vmem:[%s4051_s19 + $0x38] sm:$0xff] %v2304_v62 }
 0x26e   : > { %v2023_v50 = vpop.f32.mrf.mxu2 }
 0x26f   : > { %v2024_v51 = vadd.f32 %v2023_v50, %v1975_v19  ;;  %v2072_v52 = vpop.f32.mrf.mxu3  ;;  %v1927_v33 = vpop.f32.mrf.mxu0 }
 0x270   : > { %v1976_v55 = vpop.f32.mrf.mxu1 }
 0x271   : > { %v2073_v32 = vadd.f32 %v2072_v52, %v2024_v51  ;;  %v1977_v46 = vadd.f32 %v1976_v55, %v1927_v33 }
 0x273   : > { %v2306_v45 = vpack.c.bf16 %v2073_v32, %v4176_v36 }
 0x275   : > { %2338 = vst [vmem:[%s4051_s19 + $0x48] sm:$0xff] %v2306_v45 }
 0x276   : > { %v2025_v47 = vpop.f32.mrf.mxu2 }
 0x277   : > { %v2026_v61 = vadd.f32 %v2025_v47, %v1977_v46  ;;  %v2074_v18 = vpop.f32.mrf.mxu3  ;;  %v1930_v29 = vpop.f32.mrf.mxu0 }
 0x278   : > { %v1979_v3 = vpop.f32.mrf.mxu1 }
 0x279   : > { %v2075_v24 = vadd.f32 %v2074_v18, %v2026_v61  ;;  %v1980_v0 = vadd.f32 %v1979_v3, %v1930_v29 }
 0x27b   : > { %v2308_v48 = vpack.c.bf16 %v2075_v24, %v4178_v49 }
 0x27d   : > { %2340 = vst [vmem:[%s4051_s19 + $0x58] sm:$0xff] %v2308_v48 }
 0x27e   : > { %v2028_v13 = vpop.f32.mrf.mxu2 }
 0x27f   : > { %v2029_v14 = vadd.f32 %v2028_v13, %v1980_v0  ;;  %v2077_v20 = vpop.f32.mrf.mxu3  ;;  %v1932_v21 = vpop.f32.mrf.mxu0 }
 0x280   : > { %v1981_v22 = vpop.f32.mrf.mxu1 }
 0x281   : > { %v2078_v36 = vadd.f32 %v2077_v20, %v2029_v14  ;;  %v1982_v31 = vadd.f32 %v1981_v22, %v1932_v21 }
 0x283   : > { %v2310_v4 = vpack.c.bf16 %v2078_v36, %v4184_v2 }
 0x285   : > { %2342 = vst [vmem:[%s4051_s19 + $0x68] sm:$0xff] %v2310_v4 }
 0x286   : > { %v2030_v53 = vpop.f32.mrf.mxu2 }
 0x287   : > { %v2031_v54 = vadd.f32 %v2030_v53, %v1982_v31  ;;  %v2079_v35 = vpop.f32.mrf.mxu3  ;;  %v1935_v16 = vpop.f32.mrf.mxu0 }
 0x288   : > { %v1984_v28 = vpop.f32.mrf.mxu1 }
 0x289   : > { %v2080_v49 = vadd.f32 %v2079_v35, %v2031_v54  ;;  %v1985_v60 = vadd.f32 %v1984_v28, %v1935_v16 }
 0x28b   : > { %v2312_v5 = vpack.c.bf16 %v2080_v49, %v4186_v12 }
 0x28d   : > { %2344 = vst [vmem:[%s4051_s19 + $0x78] sm:$0xff] %v2312_v5 }
 0x28e   : > { %v2033_v37 = vpop.f32.mrf.mxu2 }
 0x28f   : > { %v2034_v41 = vadd.f32 %v2033_v37, %v1985_v60  ;;  %v2082_v42 = vpop.f32.mrf.mxu3  ;;  %v1937_v43 = vpop.f32.mrf.mxu0 }
 0x290   : > { %v1986_v23 = vpop.f32.mrf.mxu1 }
 0x291   : > { %v2083_v2 = vadd.f32 %v2082_v42, %v2034_v41  ;;  %v1987_v30 = vadd.f32 %v1986_v23, %v1937_v43 }
 0x293   : > { %v2314_v38 = vpack.c.bf16 %v2083_v2, %v4192_v57 }
 0x295   : > { %2346 = vst [vmem:[%s4051_s19 + $0x88] sm:$0xff] %v2314_v38 }
 0x296   : > { %v2035_v26 = vpop.f32.mrf.mxu2 }
 0x297   : > { %v2036_v27 = vadd.f32 %v2035_v26, %v1987_v30  ;;  %v2084_v58 = vpop.f32.mrf.mxu3  ;;  %v1940_v6 = vpop.f32.mrf.mxu0 }
 0x298   : > { %v1989_v7 = vpop.f32.mrf.mxu1 }
 0x299   : > { %v2085_v12 = vadd.f32 %v2084_v58, %v2036_v27  ;;  %v1990_v59 = vadd.f32 %v1989_v7, %v1940_v6 }
 0x29b   : > { %v2316_v56 = vpack.c.bf16 %v2085_v12, %v4194_v40 }
 0x29d   : > { %2348 = vst [vmem:[%s4051_s19 + $0x98] sm:$0xff] %v2316_v56 }
 0x29e   : > { %v2038_v9 = vpop.f32.mrf.mxu2 }
 0x29f   : > { %v2039_v10 = vadd.f32 %v2038_v9, %v1990_v59  ;;  %v2087_v11 = vpop.f32.mrf.mxu3  ;;  %v1942_v39 = vpop.f32.mrf.mxu0 }
 0x2a0   : > { %v1991_v63 = vpop.f32.mrf.mxu1 }
 0x2a1   : > { %v2088_v57 = vadd.f32 %v2087_v11, %v2039_v10  ;;  %v1992_v62 = vadd.f32 %v1991_v63, %v1942_v39 }
 0x2a3   : > { %v2318_v17 = vpack.c.bf16 %v2088_v57, %v4200_v25 }
 0x2a5   : > { %2350 = vst [vmem:[%s4051_s19 + $0xa8] sm:$0xff] %v2318_v17 }
 0x2a6   : > { %v2040_v19 = vpop.f32.mrf.mxu2 }
 0x2a7   : > { %v2041_v50 = vadd.f32 %v2040_v19, %v1992_v62  ;;  %v2089_v51 = vpop.f32.mrf.mxu3  ;;  %v1945_v52 = vpop.f32.mrf.mxu0 }
 0x2a8   : > { %v1994_v33 = vpop.f32.mrf.mxu1 }
 0x2a9   : > { %v2090_v40 = vadd.f32 %v2089_v51, %v2041_v50  ;;  %v1995_v32 = vadd.f32 %v1994_v33, %v1945_v52 }
 0x2ab   : > { %v2320_v55 = vpack.c.bf16 %v2090_v40, %v4202_v8 }
 0x2ad   : > { %2352 = vst [vmem:[%s4051_s19 + $0xb8] sm:$0xff] %v2320_v55 }
 0x2ae   : > { %v2043_v45 = vpop.f32.mrf.mxu2 }
 0x2af   : > { %v2044_v46 = vadd.f32 %v2043_v45, %v1995_v32  ;;  %v2092_v47 = vpop.f32.mrf.mxu3  ;;  %v1947_v61 = vpop.f32.mrf.mxu0 }
 0x2b0   : > { %v1996_v18 = vpop.f32.mrf.mxu1 }
 0x2b1   : > { %v2093_v25 = vadd.f32 %v2092_v47, %v2044_v46  ;;  %v1997_v3 = vadd.f32 %v1996_v18, %v1947_v61 }
 0x2b3   : > { %v2322_v29 = vpack.c.bf16 %v2093_v25, %v4208_v1 }
 0x2b5   : > { %2354 = vst [vmem:[%s4051_s19 + $0xc8] sm:$0xff] %v2322_v29 }
 0x2b6   : > { %v2045_v24 = vpop.f32.mrf.mxu2 }
 0x2b7   : > { %v2046_v48 = vadd.f32 %v2045_v24, %v1997_v3  ;;  %v2094_v0 = vpop.f32.mrf.mxu3  ;;  %v1950_v13 = vpop.f32.mrf.mxu0 }
 0x2b8   : > { %v1999_v8 = vpop.f32.mrf.mxu1 }
 0x2b9   : > { %v2095_v14 = vadd.f32 %v2094_v0, %v2046_v48  ;;  %v2000_v21 = vadd.f32 %v1999_v8, %v1950_v13 }
 0x2bb   : > { %v2324_v20 = vpack.c.bf16 %v2095_v14, %v4210_v44 }
 0x2bd   : > { %2356 = vst [vmem:[%s4051_s19 + $0xd8] sm:$0xff] %v2324_v20 }
 0x2be   : > { %v2048_v22 = vpop.f32.mrf.mxu2 }
 0x2bf   : > { %v2049_v36 = vadd.f32 %v2048_v22, %v2000_v21  ;;  %v2097_v4 = vpop.f32.mrf.mxu3  ;;  %v1952_v1 = vpop.f32.mrf.mxu0 }
 0x2c0   : > { %v2001_v53 = vpop.f32.mrf.mxu1 }
 0x2c1   : > { %v2098_v31 = vadd.f32 %v2097_v4, %v2049_v36  ;;  %v2002_v35 = vadd.f32 %v2001_v53, %v1952_v1 }
 0x2c3   : > { %v2326_v54 = vpack.c.bf16 %v2098_v31, %v4216_v34 }
 0x2c5   : > { %2358 = vst [vmem:[%s4051_s19 + $0xe8] sm:$0xff] %v2326_v54 }
 0x2c6   : > { %v2050_v44 = vpop.f32.mrf.mxu2 }
 0x2c7   : > { %v2051_v16 = vadd.f32 %v2050_v44, %v2002_v35  ;;  %v2099_v28 = vpop.f32.mrf.mxu3 }
 0x2c9   : > { %v2100_v49 = vadd.f32 %v2099_v28, %v2051_v16 }
 0x2cb   : > { %v2328_v5 = vpack.c.bf16 %v2100_v49, %v4218_v15 }
 0x2cd   : > { %2360 = vst [vmem:[%s4051_s19 + $0xf8] sm:$0xff] %v2328_v5 }
 0x2ce   : > { %3472 = shalt.err (!%p3469_p0)
}
 0x2cf   : > { %s3537_s30 = smov 256   ;;  %s3538_s6 = smov 512  }
 0x2d0   : > { %s3539_s7 = smov 16  }
 0x2d1   : > { %3312 = dma.vmem_to_hbm [thread:$0]  (%p3637_p5), %s2378_s16, 4096, %s2380_s21, %s2362_s12, %s3537_s30, %s3538_s6, %s3539_s7  }
 0x2d2 PF: > { %s2394_s17 = sand.u32 1, %s3511_s9   ;;  %p3323_p3 = pnand %p2491_p11, %p3604_p6 }
 0x2d3   : > { %s2395_s19 = scalar_lea.sflag [#allocation5], %s2394_s17 }
 0x2d4   : > { %p3324_p7 = pneg %p3323_p3 }
 0x2d6   : > { %3506 = dma.done.wait (%p3324_p7), %s2395_s19, 4096  }
 0x2d7   : > { %3508 = vsyncadd (%p3324_p7), %s2395_s19, 4294963200  ;;  %s19_s14 = sadd.s32 1, %s3531_s14   ;;  %s4307_s9 = smov %s3515_s10 }
 0x2d8   : > { %p16_p9 = scmp.ge.s32.totalorder %s19_s14, 4   ;;  %s4308_s10 = smov %s3519_s11 }
 0x2d9   : > { %s4309_s11 = smov %s3646_s8  ;;  %s4310_s12 = smov %s3527_s13 }
 0x2da   : > { %s4311_s13 = smov %s4313_s29  ;;  %18 = sbr.rel (!%p16_p9) target bundleno = 7 (0x7), region = 87 }
 0x2df   :  { %2401 = vsyncpa [#allocation4], 1 }
 0x2e0   :  { %2403 = vsyncpa [#allocation4 + $0x1], 1 }
 0x2e1   :  { %2404 = vsyncpa [#allocation7], 1 }
 0x2e2   :  { %2406 = vsyncpa [#allocation7 + $0x1], 1 }
 0x2e3   :  { %2407 = vsyncpa [#allocation5], 1 }
 0x2e4   :  { %2409 = vsyncpa [#allocation5 + $0x1], 1 }

</bundles_post_ra>
